<compile_context>
chip_gen: v7x
topology: tpu7x:2x2x1
jax: 0.10.0
libtpu: 0.0.40
codegen_flags: <defaults>
</compile_context>

<pallas_src>
import functools

import jax
import jax.numpy as jnp
from jax import lax
from jax.experimental import pallas as pl
from jax.experimental.pallas import tpu as pltpu


def _fused_kernel(xt_ref, xs_ref, w_ref, b_ref, o_ref, yt_acc, *, neg_slope):
    # xt_ref: (1, C, N)        X^T for this batch (lane-dense: N on the lane axis)
    # xs_ref: (1, C, TQ)       KV strip = columns [t*TQ, (t+1)*TQ) of X^T
    # w_ref : (C_out, C)       1x1-conv weight
    # b_ref : (C_out, 1)       1x1-conv bias
    # o_ref : (1, C_out, C, Q) o[0, o, r, j] = LeakyReLU(Z)[o, j*C + r],  Q = N // C
    # yt_acc: VMEM (C, N) f32  Y^T accumulator, persists across the strip grid axis
    t = pl.program_id(1)
    n_strips = pl.num_programs(1)

    xt = xt_ref[0]                                   # (C, N) f32
    xs = xs_ref[0]                                   # (C, TQ) f32
    C = xt.shape[0]

    @pl.when(t == 0)
    def _init():
        yt_acc[...] = jnp.zeros_like(yt_acc)

    # ---- attention strip: columns [t*TQ, (t+1)*TQ) of the (N, N) logits ----
    # S[:, strip] = X @ X_strip^T  (contraction over channels; f32 accumulate)
    s = lax.dot_general(xt, xs, (((0,), (0,)), ((), ())),
                        preferred_element_type=jnp.float32)          # (N, TQ)
    # column softmax (torch softmax over dim=1 == over the row index n)
    m = jnp.max(s, axis=0, keepdims=True)                            # (1, TQ)
    e = jnp.exp(s - m)                                               # (N, TQ), reuses s slab
    d = jnp.sum(e, axis=0, keepdims=True)                            # (1, TQ)
    p = e * pl.reciprocal(d, approx=True)                            # (N, TQ) f32 weights
    # Y^T += X_strip^T @ P_strip^T   (contraction depth TQ; output (C, N) lane-dense)
    yt_acc[...] += lax.dot_general(xs, p, (((1,), (1,)), ((), ())),
                                   preferred_element_type=jnp.float32)

    # ---- last strip: residual + 1x1 conv + LeakyReLU ----
    @pl.when(t == n_strips - 1)
    def _finalize():
        rt = xt + yt_acc[...]                        # R^T (C, N): rt[c, n] = R_flat[n*C + c]
        C_out = o_ref.shape[1]
        Q = o_ref.shape[3]
        w = w_ref[...]                               # (C_out, C)
        b = b_ref[...]                               # (C_out, 1)
        # Z[o, j*C + r] = sum_c' W[o, c'] * R_view[c', j*C + r] + b[o]
        #              = sum_c' W[o, c'] * rt[r, c'*Q + j]      + b[o]
        # Accumulated as A[o, r, j]: O(C * C_out * N) work, tiny vs the O(N^2) attention.
        acc = jnp.zeros((C_out, C, Q), jnp.float32)
        for cp in range(C):                          # static unroll (C is small)
            acc = acc + (w[:, cp:cp + 1][:, :, None]
                         * rt[:, cp * Q:(cp + 1) * Q][None, :, :])
        z = acc + b[:, :, None]
        o_ref[...] = jnp.where(z > 0, z, neg_slope * z)[None].astype(o_ref.dtype)


def _pick_tq(n):
    # TODO(synk): TQ=128 is the better fit for v5e's 4x128x128 MXU; 256 targets v6e/v7x.
    for tq in (256, 128):
        if n >= tq and n % tq == 0:
            return tq
    # TODO(synk): mask the tail strip instead of a single full-width strip when N is not
    #             a multiple of 128 (the fallback is only safe for small N).
    return n


def self_attention_spe(feature, conv_w, conv_b, *, negative_slope=0.01):
    """feature: (B, C, H, W) f32; conv_w: (C_out, C) 1x1-conv weight; conv_b: (C_out,)."""
    B, C, H, W = feature.shape
    C_out = conv_w.shape[0]
    N = H * W
    # The fused conv path needs C | H*W (R_view rows decompose into Q-column slices of R^T).
    # TODO(synk): two-call fallback (XLA reshape between attention and conv) otherwise.
    assert N % C == 0, "fused kernel requires H*W % C == 0"
    Q = N // C

    tq = _pick_tq(N)
    n_strips = N // tq

    # X = feature.reshape(B, N, C) is the torch row-major reinterpret; the kernel wants X^T.
    # This transpose is one cheap XLA pass over O(B*C*N) bytes, negligible vs O(N^2) work.
    xt = jnp.swapaxes(feature.reshape(B, N, C), 1, 2)        # (B, C, N)
    b2 = conv_b.reshape(C_out, 1)

    kernel = functools.partial(_fused_kernel, neg_slope=negative_slope)

    out4 = pl.pallas_call(
        kernel,
        out_shape=jax.ShapeDtypeStruct((B, C_out, C, Q), jnp.float32),
        grid=(B, n_strips),
        in_specs=[
            pl.BlockSpec((1, C, N), lambda b, t: (b, 0, 0)),    # resident across strips
            pl.BlockSpec((1, C, tq), lambda b, t: (b, 0, t)),   # current KV strip
            pl.BlockSpec((C_out, C), lambda b, t: (0, 0)),
            pl.BlockSpec((C_out, 1), lambda b, t: (0, 0)),
        ],
        out_specs=pl.BlockSpec((1, C_out, C, Q), lambda b, t: (b, 0, 0, 0)),
        scratch_shapes=[pltpu.VMEM((C, N), jnp.float32)],
        compiler_params=pltpu.CompilerParams(
            # Batch axis is megacore-shardable; the strip axis is a sequential reduction.
            # TODO(synk): for B == 1 on v7x, split the strip axis across cores with
            #             per-core partial Y^T and a cheap combine.
            dimension_semantics=("parallel", "arbitrary")),
    )(xt, xt, conv_w, b2)

    # out4[b, o, r, j] = LeakyReLU(Z)[b, o, j*C + r]; put lanes back into (h, w) order.
    # Cheap XLA transpose + free reshapes over O(B * C_out * N) elements.
    return jnp.transpose(out4, (0, 1, 3, 2)).reshape(B, C_out, H, W)


def _reference(feature, conv_w, conv_b):
    # Pure-JAX (f32) mirror of the PyTorch forward, for verification.
    B, C, H, W = feature.shape
    N = H * W
    spas = feature.reshape(B, N, C)
    spat = jnp.swapaxes(spas, 1, 2)
    m1 = jnp.einsum('bnc,bcm->bnm', spas, spat)
    sm = jax.nn.softmax(m1, axis=1)
    m2 = jnp.einsum('bnm,bmc->bnc', sm, spas)
    resh = m2.reshape(B, C, H, W)
    pre = feature + resh
    conv = jnp.einsum('oc,bchw->bohw', conv_w, pre) + conv_b[None, :, None, None]
    return jnp.where(conv > 0, conv, 0.01 * conv)


if __name__ == "__main__":
    key = jax.random.PRNGKey(0)
    # Second shape (N=1024, 4 strips of 256) exercises the multi-strip accumulator path.
    for (B, C, H, W) in [(2, 4, 16, 16), (1, 4, 32, 32)]:
        kx, kw, kb, key = jax.random.split(key, 4)
        feature = jax.random.normal(kx, (B, C, H, W), dtype=jnp.float32)
        conv_w = 0.1 * jax.random.normal(kw, (C, C), dtype=jnp.float32)
        conv_b = 0.1 * jax.random.normal(kb, (C,), dtype=jnp.float32)

        out = jax.block_until_ready(self_attention_spe(feature, conv_w, conv_b))
        ref = _reference(feature, conv_w, conv_b)
        assert out.shape == (B, C, H, W)
        err = float(jnp.max(jnp.abs(out - ref)))
        # Tolerance covers the approx EUP reciprocal and MXU accumulation differences.
        assert jnp.allclose(out, ref, atol=2e-2, rtol=2e-2), f"max abs err = {err}"
    print("KERNEL_OK")
</pallas_src>

<mosaic_0001>
module attributes {stable_mosaic.version = 11 : i64} {
  func.func @_fused_kernel(%arg0: i32, %arg1: i32, %arg2: memref<1x4x256xf32, #tpu.memory_space<vmem>>, %arg3: memref<1x4x256xf32, #tpu.memory_space<vmem>>, %arg4: memref<4x4xf32, #tpu.memory_space<vmem>>, %arg5: memref<4x1xf32, #tpu.memory_space<vmem>>, %arg6: memref<1x4x4x64xf32, #tpu.memory_space<vmem>>, %arg7: memref<4x256xf32, #tpu.memory_space<vmem>>) attributes {dimension_semantics = [#tpu.dimension_semantics<parallel>, #tpu.dimension_semantics<arbitrary>], iteration_bounds = array<i64: 2, 1>, scalar_prefetch = 0 : i64, scratch_operands = 1 : i64, tpu.core_type = #tpu.core_type<tc>, window_params = [{transform_indices = @transform_0, window_bounds = array<i64: 1, 4, 256>}, {transform_indices = @transform_1, window_bounds = array<i64: 1, 4, 256>}, {pipeline_mode = #tpu.pipeline_mode<synchronous>, transform_indices = @transform_2, window_bounds = array<i64: 4, 4>}, {pipeline_mode = #tpu.pipeline_mode<synchronous>, transform_indices = @transform_3, window_bounds = array<i64: 4, 1>}, {transform_indices = @transform_4, window_bounds = array<i64: 1, 4, 4, 64>}]} {
    %c0 = arith.constant 0 : index
    %c0_0 = arith.constant 0 : index
    %c0_1 = arith.constant 0 : index
    %0 = vector.load %arg2[%c0, %c0_0, %c0_1] : memref<1x4x256xf32, #tpu.memory_space<vmem>>, vector<1x4x256xf32>
    %1 = vector.shape_cast %0 : vector<1x4x256xf32> to vector<4x256xf32>
    %c0_2 = arith.constant 0 : index
    %c0_3 = arith.constant 0 : index
    %c0_4 = arith.constant 0 : index
    %2 = vector.load %arg3[%c0_2, %c0_3, %c0_4] : memref<1x4x256xf32, #tpu.memory_space<vmem>>, vector<1x4x256xf32>
    %3 = vector.shape_cast %2 : vector<1x4x256xf32> to vector<4x256xf32>
    %c0_i32 = arith.constant 0 : i32
    %4 = arith.cmpi eq, %arg1, %c0_i32 : i32
    %5 = arith.extui %4 : i1 to i32
    %c0_i32_5 = arith.constant 0 : i32
    %6 = arith.cmpi ne, %5, %c0_i32_5 : i32
    scf.if %6 {
      %cst_15 = arith.constant 0.000000e+00 : f32
      %25 = vector.broadcast %cst_15 : f32 to vector<4x256xf32>
      %c0_16 = arith.constant 0 : index
      %c0_17 = arith.constant 0 : index
      %26 = vector.load %arg7[%c0_16, %c0_17] : memref<4x256xf32, #tpu.memory_space<vmem>>, vector<4x256xf32>
      tpu.vector_store %arg7[%c0_16, %c0_17], %25 {strides = array<i32>} : memref<4x256xf32, #tpu.memory_space<vmem>>, vector<4x256xf32>,
    } else {
    }
    %cst = arith.constant dense<0.000000e+00> : vector<256x256xf32>
    %7 = tpu.matmul %1, %3, %cst {dimension_numbers = #tpu.dot_dimension_numbers<[0], [0], [1], [1], [0, 1, 1, 1], [], []>} : vector<4x256xf32>, vector<4x256xf32>, vector<256x256xf32> -> vector<256x256xf32>
    %cst_6 = arith.constant dense<0xFF800000> : vector<256xf32>
    %8 = vector.multi_reduction <maximumf>, %7, %cst_6 [0] : vector<256x256xf32> to vector<256xf32>
    %9 = vector.shape_cast %8 : vector<256xf32> to vector<1x256xf32>
    %10 = vector.broadcast %9 : vector<1x256xf32> to vector<256x256xf32>
    %11 = arith.subf %7, %10 : vector<256x256xf32>
    %12 = math.exp %11 : vector<256x256xf32>
    %cst_7 = arith.constant dense<0.000000e+00> : vector<256xf32>
    %13 = vector.multi_reduction <add>, %12, %cst_7 [0] : vector<256x256xf32> to vector<256xf32>
    %14 = vector.shape_cast %13 : vector<256xf32> to vector<1x256xf32>
    %15 = tpu.reciprocal %14 {approx = true} : vector<1x256xf32> -> vector<1x256xf32>
    %16 = vector.broadcast %15 : vector<1x256xf32> to vector<256x256xf32>
    %17 = arith.mulf %12, %16 : vector<256x256xf32>
    %c0_8 = arith.constant 0 : index
    %c0_9 = arith.constant 0 : index
    %18 = vector.load %arg7[%c0_8, %c0_9] : memref<4x256xf32, #tpu.memory_space<vmem>>, vector<4x256xf32>
    %cst_10 = arith.constant dense<0.000000e+00> : vector<4x256xf32>
    %19 = tpu.matmul %3, %17, %cst_10 {dimension_numbers = #tpu.dot_dimension_numbers<[1], [1], [0], [0], [0, 0, 1, 0], [], []>} : vector<4x256xf32>, vector<256x256xf32>, vector<4x256xf32> -> vector<4x256xf32>
    %20 = arith.addf %18, %19 : vector<4x256xf32>
    %c0_11 = arith.constant 0 : index
    %c0_12 = arith.constant 0 : index
    %21 = vector.load %arg7[%c0_11, %c0_12] : memref<4x256xf32, #tpu.memory_space<vmem>>, vector<4x256xf32>
    tpu.vector_store %arg7[%c0_11, %c0_12], %20 {strides = array<i32>} : memref<4x256xf32, #tpu.memory_space<vmem>>, vector<4x256xf32>,
    %c0_i32_13 = arith.constant 0 : i32
    %22 = arith.cmpi eq, %arg1, %c0_i32_13 : i32
    %23 = arith.extui %22 : i1 to i32
    %c0_i32_14 = arith.constant 0 : i32
    %24 = arith.cmpi ne, %23, %c0_i32_14 : i32
    scf.if %24 {
      %c0_15 = arith.constant 0 : index
      %c0_16 = arith.constant 0 : index
      %25 = vector.load %arg7[%c0_15, %c0_16] : memref<4x256xf32, #tpu.memory_space<vmem>>, vector<4x256xf32>
      %26 = arith.addf %1, %25 : vector<4x256xf32>
      %c0_17 = arith.constant 0 : index
      %c0_18 = arith.constant 0 : index
      %27 = vector.load %arg4[%c0_17, %c0_18] : memref<4x4xf32, #tpu.memory_space<vmem>>, vector<4x4xf32>
      %c0_19 = arith.constant 0 : index
      %c0_20 = arith.constant 0 : index
      %28 = vector.load %arg5[%c0_19, %c0_20] : memref<4x1xf32, #tpu.memory_space<vmem>>, vector<4x1xf32>
      %cst_21 = arith.constant 0.000000e+00 : f32
      %29 = vector.broadcast %cst_21 : f32 to vector<4x4x64xf32>
      %30 = vector.extract_strided_slice %27 {offsets = [0, 0], sizes = [4, 1], strides = [1, 1]} : vector<4x4xf32> to vector<4x1xf32>
      %31 = vector.shape_cast %30 : vector<4x1xf32> to vector<4x1x1xf32>
      %32 = vector.extract_strided_slice %26 {offsets = [0, 0], sizes = [4, 64], strides = [1, 1]} : vector<4x256xf32> to vector<4x64xf32>
      %33 = vector.shape_cast %32 : vector<4x64xf32> to vector<1x4x64xf32>
      %34 = vector.broadcast %31 : vector<4x1x1xf32> to vector<4x4x64xf32>
      %35 = vector.broadcast %33 : vector<1x4x64xf32> to vector<4x4x64xf32>
      %36 = arith.mulf %34, %35 : vector<4x4x64xf32>
      %37 = arith.addf %29, %36 : vector<4x4x64xf32>
      %38 = vector.extract_strided_slice %27 {offsets = [0, 1], sizes = [4, 1], strides = [1, 1]} : vector<4x4xf32> to vector<4x1xf32>
      %39 = vector.shape_cast %38 : vector<4x1xf32> to vector<4x1x1xf32>
      %40 = vector.extract_strided_slice %26 {offsets = [0, 64], sizes = [4, 64], strides = [1, 1]} : vector<4x256xf32> to vector<4x64xf32>
      %41 = vector.shape_cast %40 : vector<4x64xf32> to vector<1x4x64xf32>
      %42 = vector.broadcast %39 : vector<4x1x1xf32> to vector<4x4x64xf32>
      %43 = vector.broadcast %41 : vector<1x4x64xf32> to vector<4x4x64xf32>
      %44 = arith.mulf %42, %43 : vector<4x4x64xf32>
      %45 = arith.addf %37, %44 : vector<4x4x64xf32>
      %46 = vector.extract_strided_slice %27 {offsets = [0, 2], sizes = [4, 1], strides = [1, 1]} : vector<4x4xf32> to vector<4x1xf32>
      %47 = vector.shape_cast %46 : vector<4x1xf32> to vector<4x1x1xf32>
      %48 = vector.extract_strided_slice %26 {offsets = [0, 128], sizes = [4, 64], strides = [1, 1]} : vector<4x256xf32> to vector<4x64xf32>
      %49 = vector.shape_cast %48 : vector<4x64xf32> to vector<1x4x64xf32>
      %50 = vector.broadcast %47 : vector<4x1x1xf32> to vector<4x4x64xf32>
      %51 = vector.broadcast %49 : vector<1x4x64xf32> to vector<4x4x64xf32>
      %52 = arith.mulf %50, %51 : vector<4x4x64xf32>
      %53 = arith.addf %45, %52 : vector<4x4x64xf32>
      %54 = vector.extract_strided_slice %27 {offsets = [0, 3], sizes = [4, 1], strides = [1, 1]} : vector<4x4xf32> to vector<4x1xf32>
      %55 = vector.shape_cast %54 : vector<4x1xf32> to vector<4x1x1xf32>
      %56 = vector.extract_strided_slice %26 {offsets = [0, 192], sizes = [4, 64], strides = [1, 1]} : vector<4x256xf32> to vector<4x64xf32>
      %57 = vector.shape_cast %56 : vector<4x64xf32> to vector<1x4x64xf32>
      %58 = vector.broadcast %55 : vector<4x1x1xf32> to vector<4x4x64xf32>
      %59 = vector.broadcast %57 : vector<1x4x64xf32> to vector<4x4x64xf32>
      %60 = arith.mulf %58, %59 : vector<4x4x64xf32>
      %61 = arith.addf %53, %60 : vector<4x4x64xf32>
      %62 = vector.shape_cast %28 : vector<4x1xf32> to vector<4x1x1xf32>
      %63 = vector.broadcast %62 : vector<4x1x1xf32> to vector<4x4x64xf32>
      %64 = arith.addf %61, %63 : vector<4x4x64xf32>
      %cst_22 = arith.constant 0.000000e+00 : f32
      %65 = vector.broadcast %cst_22 : f32 to vector<4x4x64xf32>
      %66 = arith.cmpf ogt, %64, %65 : vector<4x4x64xf32>
      %cst_23 = arith.constant 0.00999999977 : f32
      %67 = vector.broadcast %cst_23 : f32 to vector<4x4x64xf32>
      %68 = arith.mulf %67, %64 : vector<4x4x64xf32>
      %69 = arith.select %66, %64, %68 : vector<4x4x64xi1>, vector<4x4x64xf32>
      %70 = vector.shape_cast %69 : vector<4x4x64xf32> to vector<1x4x4x64xf32>
      %c0_24 = arith.constant 0 : index
      %c0_25 = arith.constant 0 : index
      %c0_26 = arith.constant 0 : index
      %c0_27 = arith.constant 0 : index
      %71 = vector.load %arg6[%c0_24, %c0_25, %c0_26, %c0_27] : memref<1x4x4x64xf32, #tpu.memory_space<vmem>>, vector<1x4x4x64xf32>
      tpu.vector_store %arg6[%c0_24, %c0_25, %c0_26, %c0_27], %70 {strides = array<i32>} : memref<1x4x4x64xf32, #tpu.memory_space<vmem>>, vector<1x4x4x64xf32>,
    } else {
    }
    return
  }
  func.func @transform_0(%arg0: i32, %arg1: i32) -> (i32, i32, i32) {
    %c0_i32 = arith.constant 0 : i32
    %c0_i32_0 = arith.constant 0 : i32
    %c0_i32_1 = arith.constant 0 : i32
    return %arg0, %c0_i32, %c0_i32_0 : i32, i32, i32
  }
  func.func @transform_1(%arg0: i32, %arg1: i32) -> (i32, i32, i32) {
    %c0_i32 = arith.constant 0 : i32
    %c0_i32_0 = arith.constant 0 : i32
    return %arg0, %c0_i32, %arg1 : i32, i32, i32
  }
  func.func @transform_2(%arg0: i32, %arg1: i32) -> (i32, i32) {
    %c0_i32 = arith.constant 0 : i32
    %c0_i32_0 = arith.constant 0 : i32
    %c0_i32_1 = arith.constant 0 : i32
    return %c0_i32, %c0_i32_0 : i32, i32
  }
  func.func @transform_3(%arg0: i32, %arg1: i32) -> (i32, i32) {
    %c0_i32 = arith.constant 0 : i32
    %c0_i32_0 = arith.constant 0 : i32
    %c0_i32_1 = arith.constant 0 : i32
    return %c0_i32, %c0_i32_0 : i32, i32
  }
  func.func @transform_4(%arg0: i32, %arg1: i32) -> (i32, i32, i32, i32) {
    %c0_i32 = arith.constant 0 : i32
    %c0_i32_0 = arith.constant 0 : i32
    %c0_i32_1 = arith.constant 0 : i32
    %c0_i32_2 = arith.constant 0 : i32
    return %arg0, %c0_i32, %c0_i32_0, %c0_i32_1 : i32, i32, i32, i32
  }
}

</mosaic_0001>

<bundles_post_ra>
// kernel: tpu_custom_call.1
= control target key start
LH: loop header
LB: loop body
LE: loop exit
PB: predicated region body
PF: predicated region fallthrough
CT: control target
= control target key end

     0   :  { %9 = vsyncpa [#allocation4], 0  ;;  %s3381_s0 = inlined_call_operand.hbm [shape: f32[2,4,256], index: 0, kind: input, shape index: {}]   ;;  %s3382_s1 = inlined_call_operand.hbm [shape: f32[2,4,256], index: 1, kind: input, shape index: {}]   ;;  %s3383_s2 = inlined_call_operand.vmem [shape: f32[4,4], index: 2, kind: input, shape index: {}]   ;;  %s3384_s3 = inlined_call_operand.vmem [shape: f32[4,1], index: 3, kind: input, shape index: {}]   ;;  %s3385_s4 = inlined_call_operand.hbm [shape: f32[2,4,4,64], index: 4, kind: output, shape index: {}]  }
   0x1   :  { %11 = vsyncpa [#allocation4 + $0x1], 0 }
   0x2   :  { %12 = vsyncpa [#allocation7], 0 }
   0x3   :  { %14 = vsyncpa [#allocation7 + $0x1], 0 }
   0x4   :  { %15 = vsyncpa [#allocation5], 0 }
   0x5   :  { %17 = vsyncpa [#allocation5 + $0x1], 0  ;;  %s2080_s15 = smov 0   ;;  %s2082_s16 = smov 0  }
   0x6   :  { %s2084_s17 = smov 0   ;;  %s2086_s18 = smov 0  }
   0x7   :  { %s2088_s19 = smov 0   ;;  %s2090_s20 = smov 0  }
   0x8 LB: > { %s1555_s21 = sadd.s32 4294967295, %s2042_s20   ;;  %s1556_s22 = sadd.s32 4294967294, %s2042_s20   ;;  %s2042_s20 = sphi %s2090_s20, %s23_s20   ;;  %s2038_s19 = sphi %s2088_s19, %s3601_s19   ;;  %s2034_s18 = sphi %s2086_s18, %s3600_s18   ;;  %s2030_s17 = sphi %s2084_s17, %s3599_s17   ;;  %s2026_s16 = sphi %s2082_s16, %s3598_s16   ;;  %s2022_s15 = sphi %s2080_s15, %s3597_s15  }
   0x9   : > { %s35_s23 = sadd.s32 1, %s2038_s19  ;;  %s42_s24 = sadd.s32 1, %s2030_s17 }
   0xa   : > { %p37_p0 = scmp.ge.s32.totalorder %s35_s23, 2  ;;  %p49_p1 = scmp.ne.s32.totalorder %s2030_s17, %s2026_s16 }
   0xb   : > { %p50_p2 = scmp.eq.s32.totalorder %s2042_s20, 0  ;;  %p55_p3 = scmp.ne.s32.totalorder %s2026_s16, %s2022_s15 }
   0xc   : > { %s3603_s23 = smov (%p37_p0, %s35_s23), 0  ;;  %p56_p5 = scmp.eq.s32.totalorder %s1555_s21, 0 }
   0xd   : > { %p2121_p4 = por %p50_p2, %p49_p1  ;;  %s39_s26 = ssub.s32 %s2038_s19, %s3603_s23 }
   0xe   : > { %p149_p6 = scmp.eq.s32.totalorder %s1555_s21, 1  ;;  %p40_p7 = scmp.eq.s32.totalorder %s39_s26, 0 }
   0xf   : > { %p2127_p8 = por %p56_p5, %p55_p3  ;;  %p155_p10 = scmp.eq.s32.totalorder %s1556_s22, 1 }
  0x10   : > { %p2131_p9 = por %p149_p6, %p49_p1  ;;  %p1694_p13 = scmp.lt.s32.totalorder %s2042_s20, 2 }
  0x11   : > { %s3445_s27 = scalar_select %p2127_p8, 1, 0 }
  0x12   : > { %s3446_s28 = scalar_select %p2131_p9, 1, 0 }
  0x13   : > { %s2136_s29 = scalar_select %p40_p7, %s2030_s17, %s42_s24  }
  0x14   : > { %p2138_p11 = por %p155_p10, %p55_p3  ;;  %s2145_s5 = sand.u32 1, %s2030_s17  }
  0x15   : > { %s1559_s6 = sshll.u32 %s2145_s5, 3  ;;  %s1610_s7 = sshll.u32 %s2038_s19, 7 }
  0x16   : > { %s3447_s30 = scalar_select %p2138_p11, 1, 0 }
  0x17   : > { %s2154_s10 = scalar_lea.hbm %s3381_s0, %s1610_s7  ;;  %s185_s11 = scalar_lea.vmem [#allocation3], %s1559_s6 }
  0x18   : > { %s193_s12 = sshll.u32 %s185_s11, 4  ;;  %p2162_p0 = pnand %p1694_p13, %p2121_p4  ;;  %s2158_s12 = int_to_ptr.vmem [resolvable:$true] %s193_s12 }
  0x19   : > { %s182_s14 = scalar_lea.sflag [#allocation4], %s2145_s5  ;;  %s1896_s21 = scalar_lea.hbm %s2154_s10, 128 }
  0x1a   : > { %p1897_p3 = scmp.ne.s32.totalorder %s2154_s10, %s1896_s21  ;;  %p1898_p5 = pneg %p2162_p0 }
  0x1b   : > { %s1901_s25 = scalar_lea.hbm %s3381_s0, 256  ;;  %p1902_p4 = scmp.lt.u32.totalorder %s2154_s10, %s3381_s0 }
  0x1c   : > { %p1899_p6 = pnand %p1898_p5, %p1897_p3  ;;  %p1903_p10 = scmp.lt.u32.totalorder %s1901_s25, %s1896_s21 }
  0x1d   : > { %p1905_p12 = scmp.lt.u32.totalorder %s1896_s21, %s2154_s10 }
  0x1e   : > { %p1900_p7 = pneg %p1899_p6  ;;  %p1904_p13 = por %p1903_p10, %p1902_p4 }
  0x20   : > { %p1906_p1 = por %p1905_p12, %p1904_p13 }
  0x22   : > { %p1907_p2 = pnand %p1906_p1, %p1900_p7 }
  0x24   : > { %1910 = shalt.err (!%p1907_p2)
}
  0x25   : > { %s1911_s9 = scalar_lea.vmem %s2158_s12, 128  ;;  %s2044_s11 = smov [#allocation3]  }
  0x26   : > { %p1912_p3 = scmp.ne.s32.totalorder %s2158_s12, %s1911_s9  ;;  %s1916_s22 = sshll.u32 %s2044_s11, 4  ;;  %s1917_s22 = int_to_ptr.vmem [resolvable:$false] %s1916_s22 }
  0x27   : > { %s1918_s24 = scalar_lea.vmem %s1917_s22, 256  ;;  %p1919_p9 = scmp.lt.s32.totalorder %s2158_s12, %s1917_s22 }
  0x28   : > { %p1914_p6 = pnand %p1912_p3, %p1898_p5  ;;  %p1920_p4 = scmp.lt.s32.totalorder %s1918_s24, %s1911_s9 }
  0x2a   : > { %p1915_p11 = pneg %p1914_p6  ;;  %p1921_p10 = por %p1920_p4, %p1919_p9 }
  0x2c   : > { %p1922_p12 = pnand %p1921_p10, %p1915_p11 }
  0x2e   : > { %1925 = shalt.err (!%p1922_p12)
}
  0x2f   : > { %1686 = dma.hbm_to_vmem [thread:$0]  (!%p2162_p0), %s2154_s10, 128, %s2158_s12, %s182_s14  }
  0x30   : > { %p3449_p1 = scmp.lt.s32.totalorder %s2042_s20, 3  ;;  %p3450_p2 = scmp.ge.s32.totalorder %s2042_s20, 1 }
  0x31   : > { %s2207_s8 = scalar_lea.hbm %s3382_s1, %s1610_s7  ;;  %s204_s9 = scalar_lea.vmem [#allocation6], %s1559_s6 }
  0x32   : > { %p2198_p7 = pnand %p3450_p2, %p3449_p1  ;;  %s214_s11 = sshll.u32 %s204_s9, 4  ;;  %s215_s11 = int_to_ptr.vmem [resolvable:$true] %s214_s11 }
  0x33   : > { %s201_s10 = scalar_lea.sflag [#allocation7], %s2145_s5  ;;  %s1926_s12 = scalar_lea.hbm %s2207_s8, 128 }
  0x34   : > { %s3451_s21 = scalar_select %p2198_p7, 1, 0 }
  0x35   : > { %p1927_p9 = scmp.ne.s32.totalorder %s2207_s8, %s1926_s12  ;;  %s1931_s7 = scalar_lea.hbm %s3382_s1, 256 }
  0x36   : > { %p1932_p3 = scmp.lt.u32.totalorder %s2207_s8, %s3382_s1  ;;  %p1933_p6 = scmp.lt.u32.totalorder %s1931_s7, %s1926_s12 }
  0x37   : > { %p1929_p11 = pnand %p1927_p9, %p1898_p5  ;;  %p1935_p10 = scmp.lt.u32.totalorder %s1926_s12, %s2207_s8 }
  0x38   : > { %p1934_p4 = por %p1933_p6, %p1932_p3 }
  0x39   : > { %p1930_p13 = pneg %p1929_p11 }
  0x3a   : > { %p1936_p12 = por %p1935_p10, %p1934_p4 }
  0x3c   : > { %p1937_p1 = pnand %p1936_p12, %p1930_p13 }
  0x3e   : > { %1940 = shalt.err (!%p1937_p1)
}
  0x3f   : > { %s1941_s5 = scalar_lea.vmem %s215_s11, 128  ;;  %s2045_s6 = smov [#allocation6]  }
  0x40   : > { %p1942_p2 = scmp.ne.s32.totalorder %s215_s11, %s1941_s5  ;;  %s1946_s26 = sshll.u32 %s2045_s6, 4  ;;  %s1947_s26 = int_to_ptr.vmem [resolvable:$false] %s1946_s26 }
  0x41   : > { %s1948_s9 = scalar_lea.vmem %s1947_s26, 256  ;;  %p1949_p8 = scmp.lt.s32.totalorder %s215_s11, %s1947_s26 }
  0x42   : > { %p1944_p9 = pnand %p1942_p2, %p1898_p5  ;;  %p1950_p7 = scmp.lt.s32.totalorder %s1948_s9, %s1941_s5 }
  0x44   : > { %p1945_p11 = pneg %p1944_p9  ;;  %p1951_p3 = por %p1950_p7, %p1949_p8 }
  0x46   : > { %p1952_p6 = pnand %p1951_p3, %p1945_p11 }
  0x48   : > { %1955 = shalt.err (!%p1952_p6)
}
  0x49   : > { %1689 = dma.hbm_to_vmem [thread:$0]  (!%p2162_p0), %s2207_s8, 128, %s215_s11, %s201_s10  }
  0x4a   : > { %p3452_p13 = scmp.ne.s32.totalorder %s3451_s21, 0 }
  0x4c   : > { %223 = sbr.rel (%p3452_p13) target bundleno = 1211 (0x4bb), region = 36 }
  0x53   : > { %s2234_s12 = sand.u32 1, %s2026_s16   ;;  %p3453_p8 = scmp.ne.s32.totalorder %s3445_s27, 0 }
  0x54   : > { %s1566_s14 = sshll.u32 %s2234_s12, 3  ;;  %s226_s22 = scalar_lea.sflag [#allocation4], %s2234_s12 }
  0x55   : > { %s2238_s7 = scalar_lea.vmem [#allocation3], %s1566_s14 }
  0x56   : > { %2009 = dma.done.wait (%p3453_p8), %s226_s22, 128  }
  0x57   : > { %2011 = vsyncadd (%p3453_p8), %s226_s22, 4294967168  ;;  %s235_s13 = scalar_lea.sflag [#allocation7], %s2234_s12  ;;  %s2245_s21 = scalar_lea.vmem [#allocation6], %s1566_s14 }
  0x58   : > { %2013 = dma.done.wait (%p3453_p8), %s235_s13, 128  }
  0x59   : > { %2015 = vsyncadd (%p3453_p8), %s235_s13, 4294967168  ;;  %v2046_v0 = vmov 0.0   ;;  %v269_v1 = vld [vmem:[%s2238_s7] sm:$0xff]  ;;  %v270_v2 = vld [vmem:[%s2245_s21] sm:$0xff]  ;;  %vm442_vm0 = vcmask 1043456   ;;  %vm345_vm1 = vcmask 31744  }
  0x5a   : > { %511 = vmatprep.mubr.f32.mxu0 %v2046_v0  ;;  %279 = vxpose.xlu0.b32.start.end [1/1] (short) %v269_v1, 128  ;;  %v344_v3 = vcombine.high %v270_v2, %v270_v2  ;;  %v277_v4 = vcombine.high %v269_v1, %v269_v1  ;;  %s2052_s24 = smov 64   ;;  %s1568_s25 = sshll.u32 %s2234_s12, 4  ;;  %vm1429_vm2 = vcmask 519168  }
  0x5b   : > { %s267_s5 = scalar_lea.vmem [#allocation8], %s1568_s25  ;;  %s1612_s26 = sshll.u32 %s2034_s18, 8 }
  0x5c   : > { %1569 = vmatprep.subr.msk.mxu0 %vm442_vm0, %v344_v3  ;;  %1176 = vmatprep.mubr.f32.mxu1 %v344_v3  ;;  %s1448_s6 = sshll.u32 %s267_s5, 4  ;;  %s3327_s22 = scalar_lea.hbm %s3385_s4, %s1612_s26  ;;  %s3321_s6 = int_to_ptr.vmem [resolvable:$true] %s1448_s6 }
  0x5d   : > { %1570 = vmatpush1.msk.msra.mxu0 %vm442_vm0, %v270_v2  ;;  %s1435_s18 = scalar_lea.sflag [#allocation5], %s2234_s12  ;;  %p3594_p5 = scmp.ne.s32.totalorder %s3446_s28, 0 }
  0x5e   : > { %s2053_s13 = smov [#allocation8]  }
  0x97   : > { %311 = vxpose.xlu0.b32.start.end [1/1] (short) %v277_v4, 128 }
  0xda   : > { %v295_v5 = vpop.trf.xlu0 }
  0xdb   : > { %1571 = vmatmul.mubr.msk.f32.vlgmr.msra.gmra.mrb[0].mxu0 %vm345_vm1, %v295_v5 }
  0xdc   : > { %517 = vmatprep.mubr.f32.mxu0 %v2046_v0 }
  0xde   : > { %v296_v6 = vpop.trf.xlu0 }
  0xdf   : > { %1572 = vmatmul.mubr.msk.f32.gmra.mrb[2].mxu0 %vm345_vm1, %v296_v6 }
  0xe0   : > { %523 = vmatprep.mubr.f32.mxu0 %v2046_v0 }
  0xe2   : > { %v297_v7 = vpop.trf.xlu0 }
  0xe3   : > { %1573 = vmatmul.mubr.msk.f32.gmra.mrb[4].mxu0 %vm345_vm1, %v297_v7 }
  0xe4   : > { %529 = vmatprep.mubr.f32.mxu0 %v2046_v0 }
  0xe6   : > { %v298_v8 = vpop.trf.xlu0 }
  0xe7   : > { %1574 = vmatmul.mubr.msk.f32.gmra.mrb[6].mxu0 %vm345_vm1, %v298_v8 }
  0xe8   : > { %535 = vmatprep.mubr.f32.mxu0 %v2046_v0 }
  0xea   : > { %v299_v9 = vpop.trf.xlu0 }
  0xeb   : > { %1575 = vmatmul.mubr.msk.f32.gmra.mrb[8].mxu0 %vm345_vm1, %v299_v9 }
  0xec   : > { %541 = vmatprep.mubr.f32.mxu0 %v2046_v0 }
  0xee   : > { %v300_v10 = vpop.trf.xlu0 }
  0xef   : > { %1576 = vmatmul.mubr.msk.f32.gmra.mrb[10].mxu0 %vm345_vm1, %v300_v10 }
  0xf0   : > { %547 = vmatprep.mubr.f32.mxu0 %v2046_v0 }
  0xf2   : > { %v301_v11 = vpop.trf.xlu0 }
  0xf3   : > { %1577 = vmatmul.mubr.msk.f32.gmra.mrb[12].mxu0 %vm345_vm1, %v301_v11 }
  0xf4   : > { %553 = vmatprep.mubr.f32.mxu0 %v2046_v0 }
  0xf6   : > { %v302_v12 = vpop.trf.xlu0 }
  0xf7   : > { %1578 = vmatmul.mubr.msk.f32.gmra.mrb[14].mxu0 %vm345_vm1, %v302_v12 }
  0xf8   : > { %559 = vmatprep.mubr.f32.mxu0 %v2046_v0 }
  0xfa   : > { %v303_v13 = vpop.trf.xlu0 }
  0xfb   : > { %1579 = vmatmul.mubr.msk.f32.gmra.mrb[16].mxu0 %vm345_vm1, %v303_v13 }
  0xfc   : > { %565 = vmatprep.mubr.f32.mxu0 %v2046_v0 }
  0xfe   : > { %v304_v14 = vpop.trf.xlu0 }
  0xff   : > { %1580 = vmatmul.mubr.msk.f32.gmra.mrb[18].mxu0 %vm345_vm1, %v304_v14 }
 0x100   : > { %571 = vmatprep.mubr.f32.mxu0 %v2046_v0 }
 0x102   : > { %v305_v15 = vpop.trf.xlu0 }
 0x103   : > { %1581 = vmatmul.mubr.msk.f32.gmra.mrb[20].mxu0 %vm345_vm1, %v305_v15 }
 0x104   : > { %577 = vmatprep.mubr.f32.mxu0 %v2046_v0 }
 0x106   : > { %v306_v16 = vpop.trf.xlu0 }
 0x107   : > { %1582 = vmatmul.mubr.msk.f32.gmra.mrb[22].mxu0 %vm345_vm1, %v306_v16 }
 0x108   : > { %583 = vmatprep.mubr.f32.mxu0 %v2046_v0 }
 0x10a   : > { %v307_v17 = vpop.trf.xlu0 }
 0x10b   : > { %1583 = vmatmul.mubr.msk.f32.gmra.mrb[24].mxu0 %vm345_vm1, %v307_v17 }
 0x10c   : > { %589 = vmatprep.mubr.f32.mxu0 %v2046_v0 }
 0x10e   : > { %v308_v18 = vpop.trf.xlu0 }
 0x10f   : > { %1584 = vmatmul.mubr.msk.f32.gmra.mrb[26].mxu0 %vm345_vm1, %v308_v18 }
 0x110   : > { %595 = vmatprep.mubr.f32.mxu0 %v2046_v0 }
 0x112   : > { %v309_v19 = vpop.trf.xlu0 }
 0x113   : > { %1585 = vmatmul.mubr.msk.f32.gmra.mrb[28].mxu0 %vm345_vm1, %v309_v19 }
 0x114   : > { %601 = vmatprep.mubr.f32.mxu0 %v2046_v0 }
 0x116   : > { %v310_v20 = vpop.trf.xlu0 }
 0x117   : > { %1586 = vmatmul.mubr.msk.f32.gmra.mrb[30].mxu0 %vm345_vm1, %v310_v20 }
 0x118   : > { %607 = vmatprep.mubr.f32.mxu0 %v2046_v0 }
 0x11a   : > { %v327_v21 = vpop.trf.xlu0 }
 0x11b   : > { %1587 = vmatmul.mubr.msk.f32.gmra.mrb[32].mxu0 %vm345_vm1, %v327_v21 }
 0x11c   : > { %613 = vmatprep.mubr.f32.mxu0 %v2046_v0 }
 0x11e   : > { %v328_v22 = vpop.trf.xlu0 }
 0x11f   : > { %1588 = vmatmul.mubr.msk.f32.gmra.mrb[34].mxu0 %vm345_vm1, %v328_v22 }
 0x120   : > { %619 = vmatprep.mubr.f32.mxu0 %v2046_v0 }
 0x122   : > { %v329_v23 = vpop.trf.xlu0 }
 0x123   : > { %1589 = vmatmul.mubr.msk.f32.gmra.mrb[36].mxu0 %vm345_vm1, %v329_v23 }
 0x124   : > { %625 = vmatprep.mubr.f32.mxu0 %v2046_v0 }
 0x126   : > { %v330_v24 = vpop.trf.xlu0 }
 0x127   : > { %1590 = vmatmul.mubr.msk.f32.gmra.mrb[38].mxu0 %vm345_vm1, %v330_v24 }
 0x128   : > { %631 = vmatprep.mubr.f32.mxu0 %v2046_v0 }
 0x12a   : > { %v331_v25 = vpop.trf.xlu0 }
 0x12b   : > { %1591 = vmatmul.mubr.msk.f32.gmra.mrb[40].mxu0 %vm345_vm1, %v331_v25 }
 0x12c   : > { %637 = vmatprep.mubr.f32.mxu0 %v2046_v0 }
 0x12e   : > { %v332_v26 = vpop.trf.xlu0 }
 0x12f   : > { %1592 = vmatmul.mubr.msk.f32.gmra.mrb[42].mxu0 %vm345_vm1, %v332_v26 }
 0x130   : > { %643 = vmatprep.mubr.f32.mxu0 %v2046_v0 }
 0x132   : > { %v333_v27 = vpop.trf.xlu0 }
 0x133   : > { %1593 = vmatmul.mubr.msk.f32.gmra.mrb[44].mxu0 %vm345_vm1, %v333_v27 }
 0x134   : > { %649 = vmatprep.mubr.f32.mxu0 %v2046_v0 }
 0x136   : > { %v334_v28 = vpop.trf.xlu0 }
 0x137   : > { %1594 = vmatmul.mubr.msk.f32.gmra.mrb[46].mxu0 %vm345_vm1, %v334_v28 }
 0x138   : > { %655 = vmatprep.mubr.f32.mxu0 %v2046_v0 }
 0x13a   : > { %v335_v29 = vpop.trf.xlu0 }
 0x13b   : > { %1595 = vmatmul.mubr.msk.f32.gmra.mrb[48].mxu0 %vm345_vm1, %v335_v29 }
 0x13c   : > { %661 = vmatprep.mubr.f32.mxu0 %v2046_v0 }
 0x13e   : > { %v336_v30 = vpop.trf.xlu0 }
 0x13f   : > { %1596 = vmatmul.mubr.msk.f32.gmra.mrb[50].mxu0 %vm345_vm1, %v336_v30 }
 0x140   : > { %667 = vmatprep.mubr.f32.mxu0 %v2046_v0 }
 0x142   : > { %v337_v31 = vpop.trf.xlu0 }
 0x143   : > { %1597 = vmatmul.mubr.msk.f32.gmra.mrb[52].mxu0 %vm345_vm1, %v337_v31 }
 0x144   : > { %673 = vmatprep.mubr.f32.mxu0 %v2046_v0 }
 0x146   : > { %v338_v32 = vpop.trf.xlu0 }
 0x147   : > { %1598 = vmatmul.mubr.msk.f32.gmra.mrb[54].mxu0 %vm345_vm1, %v338_v32 }
 0x148   : > { %679 = vmatprep.mubr.f32.mxu0 %v2046_v0 }
 0x14a   : > { %v339_v33 = vpop.trf.xlu0 }
 0x14b   : > { %1599 = vmatmul.mubr.msk.f32.gmra.mrb[56].mxu0 %vm345_vm1, %v339_v33 }
 0x14c   : > { %685 = vmatprep.mubr.f32.mxu0 %v2046_v0 }
 0x14e   : > { %v340_v34 = vpop.trf.xlu0 }
 0x14f   : > { %1600 = vmatmul.mubr.msk.f32.gmra.mrb[58].mxu0 %vm345_vm1, %v340_v34 }
 0x150   : > { %691 = vmatprep.mubr.f32.mxu0 %v2046_v0 }
 0x152   : > { %v341_v35 = vpop.trf.xlu0 }
 0x153   : > { %1601 = vmatmul.mubr.msk.f32.gmra.mrb[60].mxu0 %vm345_vm1, %v341_v35 }
 0x154   : > { %697 = vmatprep.mubr.f32.mxu0 %v2046_v0 }
 0x156   : > { %v342_v36 = vpop.trf.xlu0 }
 0x157   : > { %1602 = vmatmul.mubr.msk.f32.gmra.mrb[62].mxu0 %vm345_vm1, %v342_v36 }
 0x1ae   : > { %v2317_v37 = vpop.f32.mrb[0].mxu0 }
 0x1af   : > { %v2319_v38 = vpop.f32.mrb[1].mxu0 }
 0x1b2   : > { %v2321_v39 = vpop.f32.mrb[2].mxu0 }
 0x1b3   : > { %v2323_v40 = vpop.f32.mrb[3].mxu0 }
 0x1b6   : > { %v2325_v41 = vpop.f32.mrb[4].mxu0 }
 0x1b7   : > { %v704_v42 = vmax.f32 %v2317_v37, %v2325_v41  ;;  %v2329_v43 = vpop.f32.mrb[5].mxu0 }
 0x1b8   : > { %v741_v44 = vmax.f32 %v2319_v38, %v2329_v43 }
 0x1ba   : > { %v2333_v45 = vpop.f32.mrb[6].mxu0 }
 0x1bb   : > { %v705_v46 = vmax.f32 %v2321_v39, %v2333_v45  ;;  %v2337_v47 = vpop.f32.mrb[7].mxu0 }
 0x1bc   : > { %v742_v48 = vmax.f32 %v2323_v40, %v2337_v47 }
 0x1be   : > { %v2341_v49 = vpop.f32.mrb[8].mxu0 }
 0x1bf   : > { %v706_v50 = vmax.f32 %v704_v42, %v2341_v49  ;;  %v2344_v51 = vpop.f32.mrb[9].mxu0 }
 0x1c0   : > { %v743_v52 = vmax.f32 %v741_v44, %v2344_v51 }
 0x1c2   : > { %v2347_v53 = vpop.f32.mrb[10].mxu0 }
 0x1c3   : > { %v707_v54 = vmax.f32 %v705_v46, %v2347_v53  ;;  %v2350_v55 = vpop.f32.mrb[11].mxu0 }
 0x1c4   : > { %v744_v56 = vmax.f32 %v742_v48, %v2350_v55 }
 0x1c6   : > { %v2353_v57 = vpop.f32.mrb[12].mxu0 }
 0x1c7   : > { %v708_v58 = vmax.f32 %v706_v50, %v2353_v57  ;;  %v2356_v59 = vpop.f32.mrb[13].mxu0 }
 0x1c8   : > { %v745_v60 = vmax.f32 %v743_v52, %v2356_v59 }
 0x1ca   : > { %v2359_v61 = vpop.f32.mrb[14].mxu0 }
 0x1cb   : > { %v709_v62 = vmax.f32 %v707_v54, %v2359_v61  ;;  %v2362_v63 = vpop.f32.mrb[15].mxu0 }
 0x1cc   : > { %v746_v0 = vmax.f32 %v744_v56, %v2362_v63 }
 0x1ce   : > { %v2365_v1 = vpop.f32.mrb[16].mxu0 }
 0x1cf   : > { %v710_v2 = vmax.f32 %v708_v58, %v2365_v1  ;;  %v2368_v3 = vpop.f32.mrb[17].mxu0 }
 0x1d0   : > { %v747_v4 = vmax.f32 %v745_v60, %v2368_v3 }
 0x1d2   : > { %v2371_v5 = vpop.f32.mrb[18].mxu0 }
 0x1d3   : > { %v711_v6 = vmax.f32 %v709_v62, %v2371_v5  ;;  %v2374_v7 = vpop.f32.mrb[19].mxu0 }
 0x1d4   : > { %v748_v8 = vmax.f32 %v746_v0, %v2374_v7 }
 0x1d6   : > { %v2377_v9 = vpop.f32.mrb[20].mxu0 }
 0x1d7   : > { %v712_v10 = vmax.f32 %v710_v2, %v2377_v9  ;;  %v2380_v11 = vpop.f32.mrb[21].mxu0 }
 0x1d8   : > { %v749_v12 = vmax.f32 %v747_v4, %v2380_v11 }
 0x1da   : > { %v2383_v13 = vpop.f32.mrb[22].mxu0 }
 0x1db   : > { %v713_v14 = vmax.f32 %v711_v6, %v2383_v13  ;;  %v2386_v15 = vpop.f32.mrb[23].mxu0 }
 0x1dc   : > { %3454 = vst [vmem:[#allocation12_spill] sm:$0xff] %v2386_v15  ;;  %v750_v16 = vmax.f32 %v748_v8, %v2386_v15 }
 0x1de   : > { %v2389_v17 = vpop.f32.mrb[24].mxu0 }
 0x1df   : > { %v714_v18 = vmax.f32 %v712_v10, %v2389_v17  ;;  %v2392_v19 = vpop.f32.mrb[25].mxu0 }
 0x1e0   : > { %3455 = vst [vmem:[#allocation13_spill] sm:$0xff] %v2392_v19  ;;  %v751_v20 = vmax.f32 %v749_v12, %v2392_v19 }
 0x1e2   : > { %v2395_v21 = vpop.f32.mrb[26].mxu0 }
 0x1e3   : > { %v715_v22 = vmax.f32 %v713_v14, %v2395_v21  ;;  %v2398_v23 = vpop.f32.mrb[27].mxu0 }
 0x1e4   : > { %3456 = vst [vmem:[#allocation14_spill] sm:$0xff] %v2398_v23  ;;  %v752_v24 = vmax.f32 %v750_v16, %v2398_v23 }
 0x1e6   : > { %v2401_v25 = vpop.f32.mrb[28].mxu0 }
 0x1e7   : > { %v716_v26 = vmax.f32 %v714_v18, %v2401_v25  ;;  %v2404_v27 = vpop.f32.mrb[29].mxu0 }
 0x1e8   : > { %3457 = vst [vmem:[#allocation15_spill] sm:$0xff] %v2404_v27  ;;  %v753_v28 = vmax.f32 %v751_v20, %v2404_v27 }
 0x1ea   : > { %v2407_v29 = vpop.f32.mrb[30].mxu0 }
 0x1eb   : > { %v717_v30 = vmax.f32 %v715_v22, %v2407_v29  ;;  %v2410_v31 = vpop.f32.mrb[31].mxu0 }
 0x1ec   : > { %3458 = vst [vmem:[#allocation16_spill] sm:$0xff] %v2410_v31  ;;  %v754_v32 = vmax.f32 %v752_v24, %v2410_v31 }
 0x1ee   : > { %v2413_v33 = vpop.f32.mrb[32].mxu0 }
 0x1ef   : > { %v718_v34 = vmax.f32 %v716_v26, %v2413_v33  ;;  %v2416_v35 = vpop.f32.mrb[33].mxu0 }
 0x1f0   : > { %3459 = vst [vmem:[#allocation17_spill] sm:$0xff] %v2416_v35  ;;  %v755_v36 = vmax.f32 %v753_v28, %v2416_v35 }
 0x1f2   : > { %v2419_v42 = vpop.f32.mrb[34].mxu0 }
 0x1f3   : > { %v719_v44 = vmax.f32 %v717_v30, %v2419_v42  ;;  %v2422_v46 = vpop.f32.mrb[35].mxu0 }
 0x1f4   : > { %3460 = vst [vmem:[#allocation18_spill] sm:$0xff] %v2422_v46  ;;  %v756_v48 = vmax.f32 %v754_v32, %v2422_v46 }
 0x1f6   : > { %v2425_v50 = vpop.f32.mrb[36].mxu0 }
 0x1f7   : > { %v720_v52 = vmax.f32 %v718_v34, %v2425_v50  ;;  %v2428_v54 = vpop.f32.mrb[37].mxu0 }
 0x1f8   : > { %3461 = vst [vmem:[#allocation19_spill] sm:$0xff] %v2428_v54  ;;  %v757_v56 = vmax.f32 %v755_v36, %v2428_v54 }
 0x1fa   : > { %v2431_v58 = vpop.f32.mrb[38].mxu0 }
 0x1fb   : > { %v721_v60 = vmax.f32 %v719_v44, %v2431_v58  ;;  %v2434_v62 = vpop.f32.mrb[39].mxu0 }
 0x1fc   : > { %3462 = vst [vmem:[#allocation20_spill] sm:$0xff] %v2434_v62  ;;  %v758_v0 = vmax.f32 %v756_v48, %v2434_v62 }
 0x1fe   : > { %v2437_v2 = vpop.f32.mrb[40].mxu0 }
 0x1ff   : > { %v722_v4 = vmax.f32 %v720_v52, %v2437_v2  ;;  %v2440_v6 = vpop.f32.mrb[41].mxu0 }
 0x200   : > { %3463 = vst [vmem:[#allocation21_spill] sm:$0xff] %v2440_v6  ;;  %v759_v8 = vmax.f32 %v757_v56, %v2440_v6 }
 0x202   : > { %v2443_v10 = vpop.f32.mrb[42].mxu0 }
 0x203   : > { %v723_v12 = vmax.f32 %v721_v60, %v2443_v10  ;;  %v2446_v14 = vpop.f32.mrb[43].mxu0 }
 0x204   : > { %3464 = vst [vmem:[#allocation22_spill] sm:$0xff] %v2446_v14  ;;  %v760_v16 = vmax.f32 %v758_v0, %v2446_v14 }
 0x206   : > { %v2449_v18 = vpop.f32.mrb[44].mxu0 }
 0x207   : > { %v724_v20 = vmax.f32 %v722_v4, %v2449_v18  ;;  %v2452_v22 = vpop.f32.mrb[45].mxu0 }
 0x208   : > { %3465 = vst [vmem:[#allocation23_spill] sm:$0xff] %v2452_v22  ;;  %v761_v24 = vmax.f32 %v759_v8, %v2452_v22 }
 0x20a   : > { %v2455_v26 = vpop.f32.mrb[46].mxu0 }
 0x20b   : > { %v725_v28 = vmax.f32 %v723_v12, %v2455_v26  ;;  %v2458_v30 = vpop.f32.mrb[47].mxu0 }
 0x20c   : > { %3466 = vst [vmem:[#allocation24_spill] sm:$0xff] %v2458_v30  ;;  %v762_v32 = vmax.f32 %v760_v16, %v2458_v30 }
 0x20e   : > { %v2461_v34 = vpop.f32.mrb[48].mxu0 }
 0x20f   : > { %v726_v36 = vmax.f32 %v724_v20, %v2461_v34  ;;  %v2464_v44 = vpop.f32.mrb[49].mxu0 }
 0x210   : > { %3467 = vst [vmem:[#allocation25_spill] sm:$0xff] %v2464_v44  ;;  %v763_v48 = vmax.f32 %v761_v24, %v2464_v44 }
 0x212   : > { %v2467_v52 = vpop.f32.mrb[50].mxu0 }
 0x213   : > { %v727_v56 = vmax.f32 %v725_v28, %v2467_v52  ;;  %v2470_v60 = vpop.f32.mrb[51].mxu0 }
 0x214   : > { %3468 = vst [vmem:[#allocation26_spill] sm:$0xff] %v2470_v60  ;;  %v764_v0 = vmax.f32 %v762_v32, %v2470_v60 }
 0x216   : > { %v2473_v4 = vpop.f32.mrb[52].mxu0 }
 0x217   : > { %v728_v8 = vmax.f32 %v726_v36, %v2473_v4  ;;  %v2476_v12 = vpop.f32.mrb[53].mxu0 }
 0x218   : > { %3469 = vst [vmem:[#allocation27_spill] sm:$0xff] %v2476_v12  ;;  %v765_v16 = vmax.f32 %v763_v48, %v2476_v12 }
 0x21a   : > { %v2479_v20 = vpop.f32.mrb[54].mxu0 }
 0x21b   : > { %v729_v24 = vmax.f32 %v727_v56, %v2479_v20  ;;  %v2482_v44 = vpop.f32.mrb[55].mxu0 }
 0x21c   : > { %3470 = vst [vmem:[#allocation28_spill] sm:$0xff] %v2482_v44  ;;  %v766_v28 = vmax.f32 %v764_v0, %v2482_v44 }
 0x21e   : > { %v2485_v30 = vpop.f32.mrb[56].mxu0 }
 0x21f   : > { %v730_v32 = vmax.f32 %v728_v8, %v2485_v30  ;;  %v2488_v60 = vpop.f32.mrb[57].mxu0 }
 0x220   : > { %3471 = vst [vmem:[#allocation29_spill] sm:$0xff] %v2488_v60  ;;  %v767_v36 = vmax.f32 %v765_v16, %v2488_v60 }
 0x222   : > { %v2491_v22 = vpop.f32.mrb[58].mxu0 }
 0x223   : > { %v731_v48 = vmax.f32 %v729_v24, %v2491_v22  ;;  %v2494_v12 = vpop.f32.mrb[59].mxu0 }
 0x224   : > { %3472 = vst [vmem:[#allocation30_spill] sm:$0xff] %v2494_v12  ;;  %v768_v56 = vmax.f32 %v766_v28, %v2494_v12 }
 0x226   : > { %v2497_v14 = vpop.f32.mrb[60].mxu0 }
 0x227   : > { %v732_v0 = vmax.f32 %v730_v32, %v2497_v14  ;;  %v2500_v44 = vpop.f32.mrb[61].mxu0 }
 0x228   : > { %3473 = vst [vmem:[#allocation31_spill] sm:$0xff] %v2500_v44  ;;  %v769_v8 = vmax.f32 %v767_v36, %v2500_v44 }
 0x22a   : > { %v2503_v6 = vpop.f32.mrb[62].mxu0 }
 0x22b   : > { %v733_v16 = vmax.f32 %v731_v48, %v2503_v6  ;;  %v2506_v60 = vpop.f32.mrb[63].mxu0 }
 0x22c   : > { %3474 = vst [vmem:[#allocation32_spill] sm:$0xff] %v2506_v60  ;;  %v770_v24 = vmax.f32 %v768_v56, %v2506_v60 }
 0x22d   : > { %v734_v62 = vmax.f32 %v732_v0, %v733_v16 }
 0x22e   : > { %v771_v54 = vmax.f32 %v769_v8, %v770_v24 }
 0x22f   : > { %v735_v46 = vrot.slane %v734_v62, 4 }
 0x230   : > { %v772_v28 = vrot.slane %v771_v54, 4 }
 0x231   : > { %v736_v12 = vmax.f32 %v734_v62, %v735_v46 }
 0x232   : > { %v773_v35 = vmax.f32 %v771_v54, %v772_v28 }
 0x233   : > { %v737_v31 = vrot.slane %v736_v12, 2 }
 0x234   : > { %v774_v32 = vrot.slane %v773_v35, 2 }
 0x235   : > { %v738_v27 = vmax.f32 %v736_v12, %v737_v31 }
 0x236   : > { %v775_v23 = vmax.f32 %v773_v35, %v774_v32 }
 0x237   : > { %v739_v19 = vrot.slane %v738_v27, 1 }
 0x238   : > { %v776_v36 = vrot.slane %v775_v23, 1 }
 0x239   : > { %v2509_v44 = vmax.f32 %v738_v27, %v739_v19 }
 0x23a   : > { %v2511_v15 = vmax.f32 %v775_v23, %v776_v36 }
 0x23b   : > { %v778_v48 = vsub.f32 %v2317_v37, %v2509_v44  ;;  %v780_v56 = vsub.f32 %v2321_v39, %v2509_v44  ;;  %v782_v46 = vsub.f32 %v2325_v41, %v2509_v44  ;;  %v784_v54 = vsub.f32 %v2333_v45, %v2509_v44 }
 0x23c   : > { %v786_v31 = vsub.f32 %v2341_v49, %v2509_v44  ;;  %v788_v19 = vsub.f32 %v2347_v53, %v2509_v44  ;;  %v790_v23 = vsub.f32 %v2353_v57, %v2509_v44  ;;  %v792_v37 = vsub.f32 %v2359_v61, %v2509_v44  ;;  %v3497_v57 = vld [vmem:[#allocation28_spill] sm:$0xff] }
 0x23d   : > { %v794_v39 = vsub.f32 %v2365_v1, %v2509_v44  ;;  %v796_v41 = vsub.f32 %v2371_v5, %v2509_v44  ;;  %v798_v45 = vsub.f32 %v2377_v9, %v2509_v44  ;;  %v800_v49 = vsub.f32 %v2383_v13, %v2509_v44  ;;  %v3490_v9 = vld [vmem:[#allocation23_spill] sm:$0xff]  ;;  %v3493_v1 = vld [vmem:[#allocation25_spill] sm:$0xff] }
 0x23e   : > { %v842_v12 = vmul.f32 1.442695, %v778_v48  ;;  %v846_v24 = vmul.f32 1.442695, %v780_v56  ;;  %v850_v62 = vmul.f32 1.442695, %v782_v46  ;;  %v3502_v13 = vsub.f32 %v2401_v25, %v2509_v44 }
 0x23f   : > { %v854_v36 = vmul.f32 1.442695, %v784_v54  ;;  %v858_v0 = vmul.f32 1.442695, %v786_v31  ;;  %v862_v35 = vmul.f32 1.442695, %v788_v19  ;;  %v3505_v25 = vsub.f32 %v2419_v42, %v2509_v44 }
 0x240   : > { %1762 = vpow2.f32 %v842_v12  ;;  %v866_v8 = vmul.f32 1.442695, %v790_v23  ;;  %v870_v27 = vmul.f32 1.442695, %v792_v37  ;;  %v874_v31 = vmul.f32 1.442695, %v794_v39 }
 0x241   : > { %1764 = vpow2.f32 %v846_v24  ;;  %v3477_v39 = vld [vmem:[#allocation12_spill] sm:$0xff]  ;;  %v3478_v23 = vld [vmem:[#allocation13_spill] sm:$0xff]  ;;  %v3479_v37 = vld [vmem:[#allocation14_spill] sm:$0xff]  ;;  %v882_v48 = vmul.f32 1.442695, %v798_v45 }
 0x242   : > { %1766 = vpow2.f32 %v850_v62  ;;  %v3481_v12 = vld [vmem:[#allocation15_spill] sm:$0xff]  ;;  %v3484_v19 = vld [vmem:[#allocation18_spill] sm:$0xff]  ;;  %v3488_v56 = vld [vmem:[#allocation21_spill] sm:$0xff]  ;;  %v898_v46 = vmul.f32 1.442695, %v3502_v13 }
 0x243   : > { %1768 = vpow2.f32 %v854_v36  ;;  %v878_v36 = vmul.f32 1.442695, %v796_v41  ;;  %v3483_v41 = vld [vmem:[#allocation17_spill] sm:$0xff]  ;;  %v3485_v54 = vld [vmem:[#allocation19_spill] sm:$0xff]  ;;  %v3489_v24 = vld [vmem:[#allocation22_spill] sm:$0xff] }
 0x244   : > { %1770 = vpow2.f32 %v858_v0  ;;  %v3482_v0 = vld [vmem:[#allocation16_spill] sm:$0xff]  ;;  %v3494_v45 = vld [vmem:[#allocation26_spill] sm:$0xff]  ;;  %v910_v13 = vmul.f32 1.442695, %v3505_v25 }
 0x245   : > { %1772 = vpow2.f32 %v862_v35 }
 0x246   : > { %1774 = vpow2.f32 %v866_v8 }
 0x247   : > { %1776 = vpow2.f32 %v870_v27  ;;  %v3487_v27 = vld [vmem:[#allocation20_spill] sm:$0xff] }
 0x248   : > { %1778 = vpow2.f32 %v874_v31 }
 0x249   : > { %1780 = vpow2.f32 %v878_v36  ;;  %v3498_v36 = vld [vmem:[#allocation29_spill] sm:$0xff] }
 0x24a   : > { %v2589_v62 = vpop.eup %1762  ;;  %1782 = vpow2.f32 %v882_v48 }
 0x24b   : > { %3475 = vst [vmem:[#allocation33_spill] sm:$0xff] %v2589_v62  ;;  %v2597_v35 = vpop.eup %1764 }
 0x24c   : > { %3476 = vst [vmem:[#allocation34_spill] sm:$0xff] %v2597_v35  ;;  %v970_v16 = vadd.f32 %v2597_v35, %v2589_v62  ;;  %v2611_v8 = vpop.eup %1766  ;;  %v3501_v62 = vsub.f32 %v2395_v21, %v2509_v44  ;;  %v3504_v21 = vsub.f32 %v2413_v33, %v2509_v44  ;;  %v3507_v33 = vsub.f32 %v2323_v40, %v2511_v15 }
 0x24d   : > { %3480 = vst [vmem:[#allocation12_spill] sm:$0xff] %v2611_v8  ;;  %v2624_v5 = vpop.eup %1768 }
 0x24e   : > { %v971_v32 = vadd.f32 %v2611_v8, %v970_v16  ;;  %3486 = vst [vmem:[#allocation13_spill] sm:$0xff] %v2624_v5  ;;  %v886_v16 = vmul.f32 1.442695, %v800_v49  ;;  %v2640_v53 = vpop.eup %1770  ;;  %v3499_v8 = vld [vmem:[#allocation30_spill] sm:$0xff]  ;;  %v3500_v49 = vld [vmem:[#allocation31_spill] sm:$0xff] }
 0x24f   : > { %3492 = vst [vmem:[#allocation14_spill] sm:$0xff] %v2640_v53  ;;  %v2656_v31 = vpop.eup %1772  ;;  %v894_v35 = vmul.f32 1.442695, %v3501_v62  ;;  %v906_v62 = vmul.f32 1.442695, %v3504_v21 }
 0x250   : > { %v972_v28 = vadd.f32 %v2624_v5, %v971_v32  ;;  %v3496_v32 = vsub.f32 %v2389_v17, %v2509_v44  ;;  %1784 = vpow2.f32 %v886_v16 }
 0x252   : > { %v890_v5 = vmul.f32 1.442695, %v3496_v32  ;;  %v973_v61 = vadd.f32 %v2640_v53, %v972_v28  ;;  %v2665_v32 = vpop.eup %1774 }
 0x253   : > { %v2671_v53 = vpop.eup %1776 }
 0x254   : > { %v974_v28 = vadd.f32 %v2656_v31, %v973_v61  ;;  %1786 = vpow2.f32 %v890_v5  ;;  %v2677_v60 = vpop.eup %1778  ;;  %v3503_v61 = vsub.f32 %v2407_v29, %v2509_v44 }
 0x255   : > { %1788 = vpow2.f32 %v894_v35  ;;  %v2686_v5 = vpop.eup %1780  ;;  %v3506_v35 = vsub.f32 %v2319_v38, %v2511_v15  ;;  %v3509_v38 = vsub.f32 %v2329_v43, %v2511_v15 }
 0x256   : > { %v975_v48 = vadd.f32 %v2665_v32, %v974_v28  ;;  %v902_v16 = vmul.f32 1.442695, %v3503_v61  ;;  %1790 = vpow2.f32 %v898_v46  ;;  %v2695_v61 = vpop.eup %1782  ;;  %v3508_v46 = vsub.f32 %v2425_v50, %v2509_v44 }
 0x257   : > { %v844_v29 = vmul.f32 1.442695, %v3506_v35  ;;  %v3512_v50 = vsub.f32 %v2337_v47, %v2511_v15 }
 0x258   : > { %v976_v17 = vadd.f32 %v2671_v53, %v975_v48  ;;  %1792 = vpow2.f32 %v902_v16  ;;  %v914_v21 = vmul.f32 1.442695, %v3508_v46  ;;  %v3510_v16 = vsub.f32 %v2431_v58, %v2509_v44 }
 0x259   : > { %1794 = vpow2.f32 %v906_v62  ;;  %v3515_v58 = vsub.f32 %v2344_v51, %v2511_v15 }
 0x25a   : > { %v977_v28 = vadd.f32 %v2677_v60, %v976_v17  ;;  %v848_v17 = vmul.f32 1.442695, %v3507_v33  ;;  %v2704_v25 = vpop.eup %1784  ;;  %1796 = vpow2.f32 %v910_v13  ;;  %v918_v35 = vmul.f32 1.442695, %v3510_v16 }
 0x25b   : > { %1798 = vpow2.f32 %v844_v29  ;;  %v3513_v13 = vsub.f32 %v2437_v2, %v2509_v44  ;;  %v860_v29 = vmul.f32 1.442695, %v3515_v58  ;;  %v3517_v2 = vsub.f32 %v2350_v55, %v2511_v15 }
 0x25c   : > { %v978_v48 = vadd.f32 %v2686_v5, %v977_v28  ;;  %v852_v28 = vmul.f32 1.442695, %v3509_v38  ;;  %1800 = vpow2.f32 %v848_v17  ;;  %v3516_v17 = vsub.f32 %v2443_v10, %v2509_v44 }
 0x25d   : > { %1802 = vpow2.f32 %v914_v21  ;;  %v922_v43 = vmul.f32 1.442695, %v3513_v13  ;;  %v864_v38 = vmul.f32 1.442695, %v3517_v2  ;;  %v3519_v10 = vsub.f32 %v2356_v59, %v2511_v15 }
 0x25e   : > { %v979_v42 = vadd.f32 %v2695_v61, %v978_v48  ;;  %v2713_v62 = vpop.eup %1786  ;;  %v856_v48 = vmul.f32 1.442695, %v3512_v50  ;;  %1804 = vpow2.f32 %v852_v28  ;;  %v926_v47 = vmul.f32 1.442695, %v3516_v17 }
 0x25f   : > { %3511 = vst [vmem:[#allocation15_spill] sm:$0xff] %v2713_v62  ;;  %v2722_v46 = vpop.eup %1788  ;;  %1806 = vpow2.f32 %v918_v35  ;;  %v3518_v28 = vsub.f32 %v2449_v18, %v2509_v44  ;;  %v3520_v55 = vsub.f32 %v2455_v26, %v2509_v44  ;;  %v3522_v59 = vsub.f32 %v2461_v34, %v2509_v44 }
 0x260   : > { %v980_v40 = vadd.f32 %v2704_v25, %v979_v42  ;;  %3514 = vst [vmem:[#allocation16_spill] sm:$0xff] %v2722_v46  ;;  %v2731_v42 = vpop.eup %1790  ;;  %1808 = vpow2.f32 %v856_v48 }
 0x261   : > { %1810 = vpow2.f32 %v922_v43  ;;  %v930_v51 = vmul.f32 1.442695, %v3518_v28  ;;  %v934_v48 = vmul.f32 1.442695, %v3520_v55  ;;  %v3521_v43 = vsub.f32 %v2362_v63, %v2511_v15 }
 0x262   : > { %v981_v33 = vadd.f32 %v2713_v62, %v980_v40  ;;  %v2740_v35 = vpop.eup %1792  ;;  %1812 = vpow2.f32 %v860_v29  ;;  %v868_v40 = vmul.f32 1.442695, %v3519_v10  ;;  %v938_v29 = vmul.f32 1.442695, %v3522_v59 }
 0x263   : > { %v2745_v50 = vpop.eup %1794  ;;  %1814 = vpow2.f32 %v926_v47  ;;  %v3523_v47 = vsub.f32 %v2368_v3, %v2511_v15  ;;  %v3524_v63 = vsub.f32 %v2467_v52, %v2509_v44  ;;  %v3528_v59 = vsub.f32 %v2479_v20, %v2509_v44 }
 0x264   : > { %v982_v21 = vadd.f32 %v2722_v46, %v981_v33  ;;  %v2751_v18 = vpop.eup %1796  ;;  %1816 = vpow2.f32 %v864_v38  ;;  %v872_v33 = vmul.f32 1.442695, %v3521_v43  ;;  %v3527_v43 = vsub.f32 %v2380_v11, %v2511_v15 }
 0x265   : > { %v2756_v58 = vpop.eup %1798  ;;  %1818 = vpow2.f32 %v930_v51  ;;  %v942_v38 = vmul.f32 1.442695, %v3524_v63 }
 0x266   : > { %v983_v16 = vadd.f32 %v2731_v42, %v982_v21  ;;  %v2762_v26 = vpop.eup %1800  ;;  %1820 = vpow2.f32 %v868_v40  ;;  %v876_v21 = vmul.f32 1.442695, %v3523_v47  ;;  %v3526_v40 = vsub.f32 %v2473_v4, %v2509_v44 }
 0x267   : > { %v2767_v2 = vpop.eup %1802  ;;  %1822 = vpow2.f32 %v934_v48  ;;  %v1007_v34 = vadd.f32 %v2762_v26, %v2756_v58 }
 0x268   : > { %v984_v13 = vadd.f32 %v2740_v35, %v983_v16  ;;  %v2775_v51 = vpop.eup %1804  ;;  %1824 = vpow2.f32 %v872_v33  ;;  %v3525_v16 = vsub.f32 %v2374_v7, %v2511_v15  ;;  %v946_v52 = vmul.f32 1.442695, %v3526_v40 }
 0x269   : > { %v2780_v10 = vpop.eup %1806  ;;  %1826 = vpow2.f32 %v938_v29  ;;  %v1008_v48 = vadd.f32 %v2775_v51, %v1007_v34  ;;  %v884_v33 = vmul.f32 1.442695, %v3527_v43  ;;  %v950_v29 = vmul.f32 1.442695, %v3528_v59 }
 0x26a   : > { %v985_v17 = vadd.f32 %v2745_v50, %v984_v13  ;;  %v880_v3 = vmul.f32 1.442695, %v3525_v16  ;;  %v2787_v13 = vpop.eup %1808  ;;  %1828 = vpow2.f32 %v876_v21  ;;  %v3529_v21 = vsub.f32 %v3477_v39, %v2511_v15 }
 0x26b   : > { %v2792_v7 = vpop.eup %1810  ;;  %1830 = vpow2.f32 %v942_v38  ;;  %v3530_v38 = vsub.f32 %v2485_v30, %v2509_v44 }
 0x26c   : > { %v986_v28 = vadd.f32 %v2751_v18, %v985_v17  ;;  %v1009_v17 = vadd.f32 %v2787_v13, %v1008_v48  ;;  %v2799_v47 = vpop.eup %1812  ;;  %1832 = vpow2.f32 %v880_v3  ;;  %v888_v63 = vmul.f32 1.442695, %v3529_v21 }
 0x26d   : > { %v2804_v11 = vpop.eup %1814  ;;  %1834 = vpow2.f32 %v946_v52  ;;  %v3531_v3 = vsub.f32 %v3478_v23, %v2511_v15  ;;  %v3532_v52 = vsub.f32 %v2491_v22, %v2509_v44 }
 0x26e   : > { %v987_v55 = vadd.f32 %v2767_v2, %v986_v28  ;;  %v954_v28 = vmul.f32 1.442695, %v3530_v38  ;;  %v1010_v34 = vadd.f32 %v2799_v47, %v1009_v17  ;;  %v2811_v16 = vpop.eup %1816  ;;  %1836 = vpow2.f32 %v884_v33 }
 0x26f   : > { %v892_v40 = vmul.f32 1.442695, %v3531_v3  ;;  %v2816_v39 = vpop.eup %1818  ;;  %1838 = vpow2.f32 %v950_v29  ;;  %v3533_v33 = vsub.f32 %v3479_v37, %v2511_v15  ;;  %v3534_v29 = vsub.f32 %v2497_v14, %v2509_v44 }
 0x270   : > { %v988_v4 = vadd.f32 %v2780_v10, %v987_v55  ;;  %v958_v55 = vmul.f32 1.442695, %v3532_v52  ;;  %v1011_v48 = vadd.f32 %v2811_v16, %v1010_v34  ;;  %v2823_v43 = vpop.eup %1820  ;;  %1840 = vpow2.f32 %v888_v63 }
 0x271   : > { %v896_v59 = vmul.f32 1.442695, %v3533_v33  ;;  %v2828_v23 = vpop.eup %1822  ;;  %1842 = vpow2.f32 %v954_v28  ;;  %v3535_v63 = vsub.f32 %v3481_v12, %v2511_v15  ;;  %v3536_v28 = vsub.f32 %v2503_v6, %v2509_v44 }
 0x272   : > { %v989_v20 = vadd.f32 %v2792_v7, %v988_v4  ;;  %v962_v4 = vmul.f32 1.442695, %v3534_v29  ;;  %v1012_v17 = vadd.f32 %v2823_v43, %v1011_v48  ;;  %v2835_v21 = vpop.eup %1824  ;;  %1844 = vpow2.f32 %v892_v40 }
 0x273   : > { %v900_v38 = vmul.f32 1.442695, %v3535_v63  ;;  %v2840_v37 = vpop.eup %1826  ;;  %1846 = vpow2.f32 %v958_v55  ;;  %v3537_v40 = vsub.f32 %v3482_v0, %v2511_v15  ;;  %v3538_v44 = vsub.f32 %v3483_v41, %v2511_v15 }
 0x274   : > { %v990_v30 = vadd.f32 %v2804_v11, %v989_v20  ;;  %v966_v20 = vmul.f32 1.442695, %v3536_v28  ;;  %v1013_v34 = vadd.f32 %v2835_v21, %v1012_v17  ;;  %v2847_v3 = vpop.eup %1828  ;;  %1848 = vpow2.f32 %v896_v59 }
 0x275   : > { %v904_v52 = vmul.f32 1.442695, %v3537_v40  ;;  %v2852_v12 = vpop.eup %1830  ;;  %1850 = vpow2.f32 %v962_v4  ;;  %v908_v48 = vmul.f32 1.442695, %v3538_v44  ;;  %v3539_v4 = vsub.f32 %v3484_v19, %v2511_v15 }
 0x276   : > { %v991_v22 = vadd.f32 %v2816_v39, %v990_v30  ;;  %v1014_v30 = vadd.f32 %v2847_v3, %v1013_v34  ;;  %v2856_v6 = vpop.eup %1832  ;;  %1852 = vpow2.f32 %v900_v38  ;;  %v3540_v28 = vsub.f32 %v3485_v54, %v2511_v15 }
 0x277   : > { %v2861_v33 = vpop.eup %1834  ;;  %1854 = vpow2.f32 %v966_v20 }
 0x278   : > { %v992_v14 = vadd.f32 %v2828_v23, %v991_v22  ;;  %v1015_v59 = vadd.f32 %v2856_v6, %v1014_v30  ;;  %v2865_v29 = vpop.eup %1836  ;;  %1856 = vpow2.f32 %v904_v52  ;;  %v912_v22 = vmul.f32 1.442695, %v3539_v4 }
 0x279   : > { %v2870_v17 = vpop.eup %1838  ;;  %1858 = vpow2.f32 %v908_v48  ;;  %v916_v20 = vmul.f32 1.442695, %v3540_v28  ;;  %v3542_v52 = vsub.f32 %v3487_v27, %v2511_v15 }
 0x27a   : > { %v993_v55 = vadd.f32 %v2840_v37, %v992_v14  ;;  %v1016_v41 = vadd.f32 %v2865_v29, %v1015_v59  ;;  %v2874_v38 = vpop.eup %1840  ;;  %1860 = vpow2.f32 %v912_v22 }
 0x27b   : > { %v2879_v14 = vpop.eup %1842  ;;  %1862 = vpow2.f32 %v916_v20 }
 0x27c   : > { %v994_v0 = vadd.f32 %v2852_v12, %v993_v55  ;;  %v1017_v19 = vadd.f32 %v2874_v38, %v1016_v41  ;;  %v2883_v40 = vpop.eup %1844  ;;  %v920_v55 = vmul.f32 1.442695, %v3542_v52  ;;  %v3545_v41 = vsub.f32 %v3489_v24, %v2511_v15  ;;  %v3547_v24 = vld [vmem:[#allocation24_spill] sm:$0xff] }
 0x27d   : > { %3541 = vst [vmem:[#allocation17_spill] sm:$0xff] %v2883_v40  ;;  %v2888_v30 = vpop.eup %1846  ;;  %v3546_v52 = vsub.f32 %v3490_v9, %v2511_v15  ;;  %v3549_v9 = vsub.f32 %v3493_v1, %v2511_v15 }
 0x27e   : > { %v995_v63 = vadd.f32 %v2861_v33, %v994_v0  ;;  %v1018_v54 = vadd.f32 %v2883_v40, %v1017_v19  ;;  %v2892_v48 = vpop.eup %1848  ;;  %v3544_v0 = vsub.f32 %v3488_v56, %v2511_v15  ;;  %1864 = vpow2.f32 %v920_v55 }
 0x27f   : > { %3543 = vst [vmem:[#allocation18_spill] sm:$0xff] %v2892_v48  ;;  %v2897_v4 = vpop.eup %1850  ;;  %v928_v28 = vmul.f32 1.442695, %v3545_v41  ;;  %v3548_v41 = vsub.f32 %v3547_v24, %v2511_v15 }
 0x280   : > { %v996_v34 = vadd.f32 %v2870_v17, %v995_v63  ;;  %v924_v59 = vmul.f32 1.442695, %v3544_v0  ;;  %v1019_v27 = vadd.f32 %v2892_v48, %v1018_v54  ;;  %v2901_v63 = vpop.eup %1852 }
 0x282   : > { %v997_v44 = vadd.f32 %v2879_v14, %v996_v34  ;;  %v2906_v34 = vpop.eup %1854  ;;  %v1020_v56 = vadd.f32 %v2901_v63, %v1019_v27  ;;  %1866 = vpow2.f32 %v924_v59  ;;  %v940_v59 = vmul.f32 1.442695, %v3549_v9 }
 0x283   : > { %v2910_v19 = vpop.eup %1856  ;;  %1868 = vpow2.f32 %v928_v28  ;;  %v3550_v28 = vsub.f32 %v3494_v45, %v2511_v15  ;;  %v3553_v45 = vsub.f32 %v3497_v57, %v2511_v15 }
 0x284   : > { %v998_v22 = vadd.f32 %v2888_v30, %v997_v44  ;;  %v932_v44 = vmul.f32 1.442695, %v3546_v52  ;;  %v1021_v55 = vadd.f32 %v2910_v19, %v1020_v56  ;;  %v2917_v0 = vpop.eup %1858 }
 0x285   : > { %v2923_v62 = vpop.eup %1860  ;;  %v944_v24 = vmul.f32 1.442695, %v3550_v28 }
 0x286   : > { %v999_v20 = vadd.f32 %v2897_v4, %v998_v22  ;;  %v936_v22 = vmul.f32 1.442695, %v3548_v41  ;;  %v1022_v27 = vadd.f32 %v2917_v0, %v1021_v55  ;;  %1870 = vpow2.f32 %v932_v44  ;;  %v2929_v52 = vpop.eup %1862  ;;  %v3551_v44 = vld [vmem:[#allocation27_spill] sm:$0xff] }
 0x287   : > { %v3552_v1 = vsub.f32 %v3551_v44, %v2511_v15 }
 0x288   : > { %v1000_v54 = vadd.f32 %v2906_v34, %v999_v20  ;;  %v1023_v56 = vadd.f32 %v2923_v62, %v1022_v27  ;;  %1872 = vpow2.f32 %v936_v22  ;;  %v2935_v48 = vpop.eup %1864  ;;  %v952_v22 = vmul.f32 1.442695, %v3553_v45 }
 0x289   : > { %1874 = vpow2.f32 %v940_v59  ;;  %v948_v9 = vmul.f32 1.442695, %v3552_v1  ;;  %v3554_v59 = vsub.f32 %v3498_v36, %v2511_v15 }
 0x28a   : > { %v1001_v46 = vrot.slane %v1000_v54, 4  ;;  %v1024_v55 = vadd.f32 %v2929_v52, %v1023_v56  ;;  %1876 = vpow2.f32 %v944_v24 }
 0x28b   : > { %1878 = vpow2.f32 %v948_v9  ;;  %v956_v44 = vmul.f32 1.442695, %v3554_v59  ;;  %v3556_v9 = vsub.f32 %v3500_v49, %v2511_v15 }
 0x28c   : > { %v1002_v20 = vadd.f32 %v1001_v46, %v1000_v54  ;;  %v1025_v54 = vadd.f32 %v2935_v48, %v1024_v55  ;;  %v2941_v27 = vpop.eup %1866  ;;  %1880 = vpow2.f32 %v952_v22 }
 0x28d   : > { %v2947_v40 = vpop.eup %1868  ;;  %1882 = vpow2.f32 %v956_v44  ;;  %v964_v36 = vmul.f32 1.442695, %v3556_v9 }
 0x28e   : > { %v1003_v41 = vrot.slane %v1002_v20, 2  ;;  %v1026_v56 = vadd.f32 %v2941_v27, %v1025_v54 }
 0x290   : > { %v1004_v46 = vadd.f32 %v1003_v41, %v1002_v20  ;;  %v3555_v20 = vsub.f32 %v3499_v8, %v2511_v15  ;;  %v1027_v24 = vadd.f32 %v2947_v40, %v1026_v56  ;;  %v2956_v55 = vpop.eup %1870  ;;  %v3557_v56 = vld [vmem:[#allocation32_spill] sm:$0xff] }
 0x291   : > { %v3558_v59 = vsub.f32 %v3557_v56, %v2511_v15 }
 0x292   : > { %v1005_v28 = vrot.slane %v1004_v46, 1  ;;  %v960_v41 = vmul.f32 1.442695, %v3555_v20  ;;  %v1028_v1 = vadd.f32 %v2956_v55, %v1027_v24  ;;  %v2959_v54 = vpop.eup %1872 }
 0x293   : > { %v2965_v8 = vpop.eup %1874 }
 0x294   : > { %v1006_v57 = vadd.f32 %v1005_v28, %v1004_v46  ;;  %1884 = vpow2.f32 %v960_v41  ;;  %v1029_v45 = vadd.f32 %v2959_v54, %v1028_v1  ;;  %v968_v46 = vmul.f32 1.442695, %v3558_v59  ;;  %v2971_v28 = vpop.eup %1876 }
 0x295   : > { %v2974_v20 = vpop.eup %1878 }
 0x296   : > { %1886 = vrcp.f32 %v1006_v57  ;;  %v1030_v22 = vadd.f32 %v2965_v8, %v1029_v45  ;;  %v2977_v41 = vpop.eup %1880 }
 0x297   : > { %1888 = vpow2.f32 %v964_v36  ;;  %v2980_v57 = vpop.eup %1882 }
 0x298   : > { %v1031_v44 = vadd.f32 %v2971_v28, %v1030_v22  ;;  %1890 = vpow2.f32 %v968_v46 }
 0x29a   : > { %v1032_v49 = vadd.f32 %v2974_v20, %v1031_v44 }
 0x29c   : > { %v1033_v24 = vadd.f32 %v2977_v41, %v1032_v49 }
 0x29e   : > { %v2982_v15 = vpop.eup %1884  ;;  %v1034_v1 = vadd.f32 %v2980_v57, %v1033_v24 }
 0x2a0   : > { %v2985_v9 = vpop.eup %1886  ;;  %v1035_v36 = vadd.f32 %v2982_v15, %v1034_v1 }
 0x2a1   : > { %v2988_v45 = vpop.eup %1888  ;;  %v2993_v59 = vmul.f32 %v2985_v9, %v2731_v42  ;;  %v2997_v46 = vmul.f32 %v2985_v9, %v2740_v35  ;;  %v3003_v44 = vmul.f32 %v2985_v9, %v2745_v50  ;;  %v3007_v49 = vmul.f32 %v2985_v9, %v2751_v18 }
 0x2a2   : > { %v1036_v56 = vadd.f32 %v2988_v45, %v1035_v36  ;;  %v2999_v22 = vpop.eup %1890  ;;  %v3014_v1 = vmul.f32 %v2985_v9, %v2767_v2  ;;  %v3018_v35 = vmul.f32 %v2985_v9, %v2780_v10  ;;  %v3024_v18 = vmul.f32 %v2985_v9, %v2792_v7 }
 0x2a3   : > { %v3028_v36 = vmul.f32 %v2985_v9, %v2804_v11  ;;  %v3038_v42 = vmul.f32 %v2985_v9, %v2828_v23  ;;  %v3042_v7 = vmul.f32 %v2985_v9, %v2840_v37  ;;  %v3048_v50 = vmul.f32 %v2985_v9, %v2852_v12 }
 0x2a4   : > { %v1037_v24 = vadd.f32 %v2999_v22, %v1036_v56  ;;  %3559 = vst [vmem:[#allocation19_spill] sm:$0xff] %v3014_v1  ;;  %v3032_v56 = vmul.f32 %v2985_v9, %v2816_v39  ;;  %v3052_v39 = vmul.f32 %v2985_v9, %v2861_v33  ;;  %v3056_v10 = vmul.f32 %v2985_v9, %v2870_v17 }
 0x2a5   : > { %3560 = vst [vmem:[#allocation20_spill] sm:$0xff] %v3042_v7  ;;  %3561 = vst [vmem:[#allocation21_spill] sm:$0xff] %v3048_v50  ;;  %v3062_v1 = vmul.f32 %v2985_v9, %v2879_v14  ;;  %v3066_v12 = vmul.f32 %v2985_v9, %v2888_v30  ;;  %v3074_v17 = vmul.f32 %v2985_v9, %v2897_v4 }
 0x2a6   : > { %v1038_v2 = vrot.slane %v1037_v24, 4  ;;  %3562 = vst [vmem:[#allocation22_spill] sm:$0xff] %v3052_v39  ;;  %3563 = vst [vmem:[#allocation23_spill] sm:$0xff] %v3056_v10  ;;  %v3565_v39 = vld [vmem:[#allocation33_spill] sm:$0xff]  ;;  %v3566_v10 = vld [vmem:[#allocation34_spill] sm:$0xff] }
 0x2a7   : > { %3564 = vst [vmem:[#allocation25_spill] sm:$0xff] %v3074_v17  ;;  %v1046_v4 = vmul.f32 %v2985_v9, %v3565_v39 }
 0x2a8   : > { %v1039_v23 = vadd.f32 %v1038_v2, %v1037_v24  ;;  %v3078_v24 = vmul.f32 %v2985_v9, %v2906_v34  ;;  %v1048_v34 = vmul.f32 %v2985_v9, %v3566_v10 }
 0x2aa   : > { %v1040_v14 = vrot.slane %v1039_v23, 2 }
 0x2ac   : > { %v1041_v37 = vadd.f32 %v1040_v14, %v1039_v23  ;;  %v3568_v14 = vld [vmem:[#allocation13_spill] sm:$0xff] }
 0x2ad   : > { %v1052_v39 = vmul.f32 %v2985_v9, %v3568_v14  ;;  %v2048_v14 = vmov 1966171168  }
 0x2ae   : > { %v1042_v33 = vrot.slane %v1041_v37, 1 }
 0x2b0   : > { %v1043_v7 = vadd.f32 %v1042_v33, %v1041_v37  ;;  %v3567_v37 = vld [vmem:[#allocation12_spill] sm:$0xff] }
 0x2b1   : > { %v1050_v33 = vmul.f32 %v2985_v9, %v3567_v37 }
 0x2b2   : > { %1892 = vrcp.f32 %v1043_v7 }
 0x2bc   : > { %v3084_v11 = vpop.eup %1892 }
 0x2bd   : > { %v1047_v50 = vmul.f32 %v3084_v11, %v2756_v58  ;;  %v1049_v2 = vmul.f32 %v3084_v11, %v2762_v26  ;;  %v1051_v23 = vmul.f32 %v3084_v11, %v2775_v51  ;;  %v1053_v7 = vmul.f32 %v3084_v11, %v2787_v13 }
 0x2be   : > { %v1055_v10 = vmul.f32 %v3084_v11, %v2799_v47  ;;  %v1057_v58 = vmul.f32 %v3084_v11, %v2811_v16  ;;  %v1615_v26 = vpack.c.bf16 %v1048_v34, %v1046_v4  ;;  %v3108_v51 = vmul.f32 %v3084_v11, %v2901_v63 }
 0x2bf   : > { %v1613_v30 = vpack.c.bf16 %v1049_v2, %v1047_v50  ;;  %v1617_v17 = vpack.c.bf16 %v1053_v7, %v1051_v23  ;;  %v1619_v13 = vpack.c.bf16 %v1052_v39, %v1050_v33  ;;  %v3112_v37 = vmul.f32 %v3084_v11, %v2910_v19 }
 0x2c0   : > { %v3116_v50 = vmul.f32 %v3084_v11, %v2917_v0  ;;  %v3120_v47 = vmul.f32 %v3084_v11, %v2923_v62  ;;  %v1621_v16 = vpack.c.bf16 %v1057_v58, %v1055_v10  ;;  %v3124_v63 = vmul.f32 %v3084_v11, %v2929_v52 }
 0x2c1   : > { %1614 = vmatprep.subr.bf16.mxu1 %v1613_v30  ;;  %v3128_v2 = vmul.f32 %v3084_v11, %v2935_v48  ;;  %v3132_v19 = vmul.f32 %v3084_v11, %v2941_v27  ;;  %v1641_v0 = vpack.c.bf16 %v3112_v37, %v3108_v51  ;;  %v3144_v52 = vmul.f32 %v3084_v11, %v2956_v55 }
 0x2c2   : > { %1616 = vmatpush1.bf16.xpose.msra.mxu1 %v1615_v26  ;;  %v1645_v62 = vpack.c.bf16 %v3120_v47, %v3116_v50  ;;  %v3150_v27 = vmul.f32 %v3084_v11, %v2959_v54  ;;  %v3154_v30 = vmul.f32 %v3084_v11, %v2965_v8  ;;  %v3158_v4 = vmul.f32 %v3084_v11, %v2971_v28 }
 0x2c3   : > { %1618 = vmatprep.subr.bf16.mxu1 %v1617_v17  ;;  %v3140_v17 = vmul.f32 %v3084_v11, %v2947_v40  ;;  %v1649_v48 = vpack.c.bf16 %v3128_v2, %v3124_v63  ;;  %v3164_v55 = vmul.f32 %v3084_v11, %v2974_v20  ;;  %v3168_v34 = vmul.f32 %v3084_v11, %v2977_v41 }
 0x2c4   : > { %v3172_v54 = vmul.f32 %v3084_v11, %v2980_v57  ;;  %v3180_v23 = vmul.f32 %v3084_v11, %v2982_v15  ;;  %v3184_v20 = vmul.f32 %v3084_v11, %v2988_v45  ;;  %v3190_v57 = vmul.f32 %v3084_v11, %v2999_v22  ;;  %v3569_v22 = vld [vmem:[#allocation14_spill] sm:$0xff] }
 0x2c5   : > { %v1653_v40 = vpack.c.bf16 %v3140_v17, %v3132_v19  ;;  %v2047_v33 = vmov 1   ;;  %v1206_v39 = vunpack.c.l.s4 %v2048_v14  ;;  %v1208_v15 = vlaneseq  ;;  %v1603_v14 = vld.sshfl [vmem:[%s3383_s2] sm:$0x33 pattern:$0x75316420]  ;;  %v3582_v17 = vld [vmem:[#allocation21_spill] sm:$0xff] }
 0x2c6   : > { %1752 = vset.pattern.permute.xlu1 %v2047_v33  ;;  %v2049_v10 = vmov 0   ;;  %v1054_v41 = vmul.f32 %v2985_v9, %v3569_v22  ;;  %v1056_v7 = vmul.f32 %v2985_v9, %v2656_v31  ;;  %v1061_v45 = vmul.f32 %v3084_v11, %v2835_v21 }
 0x2c7   : > { %1759 = vset.pattern.permute.xlu0 %v2049_v10  ;;  %v1207_v58 = vunpack.c.0.s8 %v1206_v39  ;;  %v1209_v26 = vshrl.u32 %v1208_v15, 7  ;;  %v1204_v8 = vcombine.high %v1603_v14, %v1603_v14  ;;  %v1060_v21 = vmul.f32 %v2985_v9, %v2671_v53 }
 0x2c8   : > { %v1623_v15 = vpack.c.bf16 %v1056_v7, %v1054_v41  ;;  %v1062_v53 = vmul.f32 %v2985_v9, %v2677_v60  ;;  %v1066_v60 = vmul.f32 %v2985_v9, %v2695_v61  ;;  %v2051_v51 = vmov 3  }
 0x2c9   : > { %v3208_v28 = vsub.s32 %v1207_v58, %v1209_v26  ;;  %v1063_v58 = vmul.f32 %v3084_v11, %v2847_v3  ;;  %v1067_v3 = vmul.f32 %v3084_v11, %v2865_v29  ;;  %v3570_v29 = vld [vmem:[#allocation17_spill] sm:$0xff]  ;;  %v3578_v50 = vpack.c.bf16 %v3028_v36, %v3024_v18 }
 0x2ca   : > { %1620 = vmatpush1.bf16.xpose.msra.mxu1 %v1619_v13  ;;  %v1059_v13 = vmul.f32 %v3084_v11, %v2823_v43  ;;  %v1058_v43 = vmul.f32 %v2985_v9, %v2665_v32  ;;  %v1064_v32 = vmul.f32 %v2985_v9, %v2686_v5  ;;  %v1068_v5 = vmul.f32 %v2985_v9, %v2704_v25 }
 0x2cb   : > { %1622 = vmatprep.subr.bf16.mxu1 %v1621_v16  ;;  %v3210_v16 = vsub.s32 0, %v1209_v26  ;;  %v1211_v39 = vrot.slane %v1603_v14, %v3208_v28  ;;  %v1065_v26 = vmul.f32 %v3084_v11, %v2856_v6  ;;  %v1218_v41 = vrot.slane %v1204_v8, %v3208_v28 }
 0x2cc   : > { %v1625_v22 = vpack.c.bf16 %v1061_v45, %v1059_v13  ;;  %v1627_v7 = vpack.c.bf16 %v1060_v21, %v1058_v43  ;;  %v1069_v6 = vmul.f32 %v3084_v11, %v2874_v38  ;;  %v1071_v38 = vmul.f32 %v3084_v11, %v3570_v29 }
 0x2cd   : > { %v1224_v31 = vrot.slane %v1211_v39, %v3210_v16  ;;  %v1629_v45 = vpack.c.bf16 %v1065_v26, %v1063_v58  ;;  %v1228_v14 = vrot.slane %v1218_v41, %v3210_v16  ;;  %v1219_v13 = vcombine.high %v1211_v39, %v1211_v39 }
 0x2ce   : > { %v1631_v39 = vpack.c.bf16 %v1064_v32, %v1062_v53  ;;  %v1635_v58 = vpack.c.bf16 %v1068_v5, %v1066_v60  ;;  %v3580_v18 = vpack.c.bf16 %v3038_v42, %v3032_v56  ;;  %v3581_v36 = vpack.c.bf16 %v3158_v4, %v3154_v30 }
 0x2cf   : > { %1262 = vperm.xlu1 %1752, %v1224_v31   ;;  %v1232_v8 = vrot.slane %v1219_v13, %v3210_v16  ;;  %v3574_v13 = vpack.c.bf16 %v2997_v46, %v2993_v59  ;;  %v3576_v59 = vld [vmem:[#allocation19_spill] sm:$0xff]  ;;  %v3589_v56 = vpack.c.bf16 %v3180_v23, %v3172_v54  ;;  %v3590_v30 = vpack.c.bf16 %v3066_v12, %v3062_v1 }
 0x2d0   : > { %v3577_v46 = vpack.c.bf16 %v3018_v35, %v3576_v59  ;;  %v3579_v35 = vpack.c.bf16 %v3150_v27, %v3144_v52  ;;  %v3583_v52 = vld [vmem:[#allocation20_spill] sm:$0xff]  ;;  %v3585_v27 = vpack.c.bf16 %v3168_v34, %v3164_v55  ;;  %v3591_v4 = vpack.c.bf16 %v3190_v57, %v3184_v20  ;;  %v3592_v55 = vld [vmem:[#allocation25_spill] sm:$0xff] }
 0x2d1   : > { %v3593_v34 = vpack.c.bf16 %v3078_v24, %v3592_v55  ;;  %v1895_v57 = vld [vmem:[%s2238_s7] sm:$0xff]  ;;  %s1956_s7 = scalar_lea.vmem %s3321_s6, 256 }
 0x2d2   : > { %1624 = vmatpush1.bf16.xpose.msra.mxu1 %v1623_v15  ;;  %v1220_v15 = vcombine.high %v1218_v41, %v1218_v41  ;;  %v3572_v41 = vld [vmem:[#allocation15_spill] sm:$0xff]  ;;  %p1957_p0 = scmp.ne.s32.totalorder %s3321_s6, %s1956_s7 }
 0x2d3   : > { %1626 = vmatprep.subr.bf16.mxu1 %v1625_v22  ;;  %1753 = vset.pattern.permute.xlu1 %v2049_v10  ;;  %v1633_v22 = vpack.c.bf16 %v1069_v6, %v1067_v3  ;;  %v1070_v61 = vmul.f32 %v2985_v9, %v3572_v41 }
 0x2d4   : > { %1238 = vperm.xlu1 %1753, %v1224_v31   ;;  %v1236_v43 = vrot.slane %v1220_v15, %v3210_v16  ;;  %p1958_p7 = pnand %p1957_p0, %p3594_p5 }
 0x2d6   : > { %p1959_p4 = pneg %p1958_p7 }
 0x2d8   : > { %1754 = vset.pattern.permute.xlu1 %v2047_v33  ;;  %v3571_v33 = vld [vmem:[#allocation18_spill] sm:$0xff] }
 0x2d9   : > { %1266 = vperm.xlu1 %1754, %v1228_v14   ;;  %v1073_v21 = vmul.f32 %v3084_v11, %v3571_v33  ;;  %v2050_v11 = vmov 2  }
 0x2da   : > { %1628 = vmatpush1.bf16.xpose.msra.mxu1 %v1627_v7  ;;  %v3573_v7 = vld [vmem:[#allocation16_spill] sm:$0xff] }
 0x2db   : > { %1630 = vmatprep.subr.bf16.mxu1 %v1629_v45  ;;  %v1637_v26 = vpack.c.bf16 %v1073_v21, %v1071_v38  ;;  %v1072_v25 = vmul.f32 %v2985_v9, %v3573_v7  ;;  %v3575_v9 = vpack.c.bf16 %v3007_v49, %v3003_v44  ;;  %v1604_v44 = vld.sshfl [vmem:[%s3384_s3] sm:$0x33 pattern:$0x75316420] }
 0x2dc   : > { %v1364_v49 = vcombine.high %v1604_v44, %v1604_v44  ;;  %v1371_v37 = vrot.slane %v1604_v44, %v3208_v28 }
 0x2dd   : > { %1270 = vperm.xlu1 %1754, %v1232_v8   ;;  %v1639_v45 = vpack.c.bf16 %v1072_v25, %v1070_v61 }
 0x2de   : > { %v1384_v47 = vrot.slane %v1371_v37, %v3210_v16  ;;  %v1379_v63 = vcombine.high %v1371_v37, %v1371_v37  ;;  %v1378_v2 = vrot.slane %v1364_v49, %v3208_v28  ;;  %v3587_v28 = vld [vmem:[#allocation22_spill] sm:$0xff] }
 0x2e0   : > { %v1392_v19 = vrot.slane %v1379_v63, %v3210_v16 }
 0x2e1   : > { %1274 = vperm.xlu1 %1754, %v1236_v43  }
 0x2e2   : > { %1632 = vmatpush1.bf16.xpose.msra.mxu1 %v1631_v39 }
 0x2e3   : > { %1634 = vmatprep.subr.bf16.mxu1 %v1633_v22 }
 0x2e5   : > { %1755 = vset.pattern.permute.xlu1 %v2049_v10 }
 0x2e6   : > { %1242 = vperm.xlu1 %1755, %v1228_v14  }
 0x2ea   : > { %1636 = vmatpush1.bf16.xpose.msra.mxu1 %v1635_v58  ;;  %1246 = vperm.xlu1 %1755, %v1232_v8  }
 0x2eb   : > { %1638 = vmatprep.subr.bf16.mxu1 %v1637_v26 }
 0x2ee   : > { %1250 = vperm.xlu1 %1755, %v1236_v43  }
 0x2f2   : > { %1640 = vmatpush1.bf16.xpose.msra.mxu1 %v1639_v45  ;;  %1756 = vset.pattern.permute.xlu1 %v2050_v11 }
 0x2f3   : > { %1642 = vmatprep.subr.bf16.mxu1 %v1641_v0  ;;  %1302 = vperm.xlu1 %1756, %v1224_v31   ;;  %v1380_v0 = vcombine.high %v1378_v2, %v1378_v2 }
 0x2f7   : > { %1306 = vperm.xlu1 %1756, %v1228_v14  }
 0x2fa   : > { %1644 = vmatpush1.bf16.xpose.msra.mxu1 %v3574_v13 }
 0x2fb   : > { %1646 = vmatprep.subr.bf16.mxu1 %v1645_v62  ;;  %1310 = vperm.xlu1 %1756, %v1232_v8   ;;  %v1396_v62 = vrot.slane %v1380_v0, %v3210_v16 }
 0x2ff   : > { %1314 = vperm.xlu1 %1756, %v1236_v43  }
 0x302   : > { %1648 = vmatpush1.bf16.xpose.msra.mxu1 %v3575_v9 }
 0x303   : > { %1650 = vmatprep.subr.bf16.mxu1 %v1649_v48  ;;  %1757 = vset.pattern.permute.xlu1 %v2051_v51  ;;  %v3584_v48 = vpack.c.bf16 %v3582_v17, %v3583_v52 }
 0x304   : > { %1329 = vperm.xlu1 %1757, %v1224_v31   ;;  %v1388_v31 = vrot.slane %v1378_v2, %v3210_v16 }
 0x306   : > { %1402 = vperm.xlu0 %1759, %v1388_v31  }
 0x308   : > { %1333 = vperm.xlu1 %1757, %v1228_v14  }
 0x30a   : > { %1652 = vmatpush1.bf16.xpose.msra.mxu1 %v3577_v46 }
 0x30b   : > { %1654 = vmatprep.subr.bf16.mxu1 %v1653_v40  ;;  %v3586_v40 = vld [vmem:[#allocation23_spill] sm:$0xff] }
 0x30c   : > { %1337 = vperm.xlu1 %1757, %v1232_v8   ;;  %v3588_v42 = vpack.c.bf16 %v3586_v40, %v3587_v28 }
 0x310   : > { %1341 = vperm.xlu1 %1757, %v1236_v43  }
 0x312   : > { %1656 = vmatpush1.bf16.xpose.msra.mxu1 %v3578_v50 }
 0x313   : > { %1658 = vmatprep.subr.bf16.mxu1 %v3579_v35 }
 0x314   : > { %1758 = vset.pattern.permute.xlu1 %v2049_v10  ;;  %v1894_v10 = vld [vmem:[%s2245_s21] sm:$0xff]  ;;  %s1960_s21 = sshll.u32 %s2053_s13, 4  ;;  %s1961_s21 = int_to_ptr.vmem [resolvable:$false] %s1960_s21 }
 0x315   : > { %1398 = vperm.xlu1 %1758, %v1384_v47   ;;  %s1962_s27 = scalar_lea.vmem %s1961_s21, 512  ;;  %p1963_p10 = scmp.lt.s32.totalorder %s3321_s6, %s1961_s21 }
 0x316   : > { %p1964_p12 = scmp.lt.s32.totalorder %s1962_s27, %s1956_s7 }
 0x318   : > { %p1965_p1 = por %p1964_p12, %p1963_p10 }
 0x319   : > { %1406 = vperm.xlu1 %1758, %v1392_v19  }
 0x31a   : > { %1660 = vmatpush1.bf16.xpose.msra.mxu1 %v3580_v18  ;;  %p1966_p2 = pnand %p1965_p1, %p1959_p4 }
 0x31b   : > { %1662 = vmatprep.subr.bf16.mxu1 %v3581_v36 }
 0x31d   : > { %1410 = vperm.xlu1 %1758, %v1396_v62  }
 0x322   : > { %1664 = vmatpush1.bf16.xpose.msra.mxu1 %v3584_v48 }
 0x323   : > { %1666 = vmatprep.subr.bf16.mxu1 %v3585_v27 }
 0x32a   : > { %1668 = vmatpush1.bf16.xpose.msra.mxu1 %v3588_v42 }
 0x32b   : > { %1670 = vmatprep.subr.bf16.mxu1 %v3589_v56 }
 0x332   : > { %1672 = vmatpush1.bf16.xpose.msra.mxu1 %v3590_v30 }
 0x333   : > { %1674 = vmatprep.subr.bf16.mxu1 %v3591_v4 }
 0x33a   : > { %1676 = vmatpush1.bf16.xpose.msra.mxu1 %v3593_v34 }
 0x341   : > { %1177 = vmatmul.mubr.f32.vlgmr.msra.gmra.mrb[0].mxu1 %v1894_v10 }
 0x34e   : > { %v1263_v54 = vpop.permute.xlu1 %1262 }
 0x353   : > { %v1239_v23 = vpop.permute.xlu1 %1238 }
 0x358   : > { %v1267_v14 = vpop.permute.xlu1 %1266 }
 0x35c   : > { %v1271_v53 = vpop.permute.xlu1 %1270 }
 0x360   : > { %v1275_v1 = vpop.permute.xlu1 %1274 }
 0x365   : > { %v1243_v12 = vpop.permute.xlu1 %1242 }
 0x369   : > { %v1247_v8 = vpop.permute.xlu1 %1246 }
 0x36d   : > { %v1251_v43 = vpop.permute.xlu1 %1250 }
 0x372   : > { %v1303_v60 = vpop.permute.xlu1 %1302 }
 0x376   : > { %v1307_v5 = vpop.permute.xlu1 %1306 }
 0x37a   : > { %v1311_v29 = vpop.permute.xlu1 %1310 }
 0x37e   : > { %v1315_v38 = vpop.permute.xlu1 %1314 }
 0x383   : > { %v1330_v33 = vpop.permute.xlu1 %1329 }
 0x385   : > { %v1403_v28 = vpop.permute.xlu0 %1402 }
 0x387   : > { %v1334_v21 = vpop.permute.xlu1 %1333 }
 0x38b   : > { %v1338_v58 = vpop.permute.xlu1 %1337 }
 0x38f   : > { %v1342_v26 = vpop.permute.xlu1 %1341 }
 0x394   : > { %v1399_v41 = vpop.permute.xlu1 %1398 }
 0x398   : > { %v1407_v61 = vpop.permute.xlu1 %1406 }
 0x39c   : > { %v1411_v7 = vpop.permute.xlu1 %1410 }
 0x414   : > { %v1178_v32 = vpop.f32.mrb[0].mxu1 }
 0x415   : > { %v1180_v3 = vpop.f32.mrb[1].mxu1 }
 0x416   : > { %v1185_v20 = vcombine.low %v1178_v32, %v1180_v3 }
 0x418   : > { %v1193_v6 = vadd.f32 %v1895_v57, %v1185_v20 }
 0x41a   : > { %v1277_v15 = vmul.f32 %v1263_v54, %v1193_v6  ;;  %v1255_v24 = vmul.f32 %v1247_v8, %v1193_v6  ;;  %v1278_v39 = vmul.f32 %v1267_v14, %v1193_v6  ;;  %v1279_v16 = vmul.f32 %v1271_v53, %v1193_v6 }
 0x41b   : > { %v1280_v22 = vmul.f32 %v1275_v1, %v1193_v6  ;;  %v1318_v11 = vrot.slane %v1193_v6, 4  ;;  %v1253_v46 = vmul.f32 %v1239_v23, %v1193_v6  ;;  %v1254_v44 = vmul.f32 %v1243_v12, %v1193_v6 }
 0x41c   : > { %1285 = vrot.lane.b32.xlu1 %v1277_v15, %s2052_s24  ;;  %v1256_v37 = vmul.f32 %v1251_v43, %v1193_v6 }
 0x41d   : > { %v1322_v9 = vmul.f32 %v1318_v11, %v1311_v29  ;;  %v1323_v63 = vmul.f32 %v1318_v11, %v1315_v38  ;;  %v1320_v2 = vmul.f32 %v1318_v11, %v1303_v60  ;;  %v1321_v19 = vmul.f32 %v1318_v11, %v1307_v5 }
 0x420   : > { %1287 = vrot.lane.b32.xlu1 %v1278_v39, %s2052_s24 }
 0x424   : > { %1289 = vrot.lane.b32.xlu1 %v1279_v16, %s2052_s24 }
 0x428   : > { %1291 = vrot.lane.b32.xlu1 %v1280_v22, %s2052_s24 }
 0x42c   : > { %1344 = vrot.lane.b32.xlu1 %v1193_v6, %s2052_s24 }
 0x48e   : > { %v1286_v25 = vpop.permute.xlu1 %1285 }
 0x48f   : > { %v1297_v50 = vadd.f32 %v1286_v25, %v1253_v46 }
 0x491   : > { %v1324_v36 = vadd.f32 %v1320_v2, %v1297_v50 }
 0x492   : > { %v1288_v45 = vpop.permute.xlu1 %1287 }
 0x493   : > { %v1298_v35 = vadd.f32 %v1288_v45, %v1254_v44 }
 0x495   : > { %v1325_v62 = vadd.f32 %v1321_v19, %v1298_v35 }
 0x496   : > { %v1290_v13 = vpop.permute.xlu1 %1289 }
 0x497   : > { %v1299_v51 = vadd.f32 %v1290_v13, %v1255_v24 }
 0x499   : > { %v1326_v59 = vadd.f32 %v1322_v9, %v1299_v51 }
 0x49a   : > { %v1292_v49 = vpop.permute.xlu1 %1291 }
 0x49b   : > { %v1300_v47 = vadd.f32 %v1292_v49, %v1256_v37 }
 0x49d   : > { %v1327_v17 = vadd.f32 %v1323_v63, %v1300_v47 }
 0x49e   : > { %v1345_v0 = vpop.permute.xlu1 %1344 }
 0x49f   : > { %v1346_v18 = vrot.slane %v1345_v0, 4 }
 0x4a1   : > { %v1348_v52 = vmul.f32 %v1346_v18, %v1330_v33  ;;  %v1350_v48 = vmul.f32 %v1346_v18, %v1338_v58  ;;  %v1351_v27 = vmul.f32 %v1346_v18, %v1342_v26  ;;  %v1349_v40 = vmul.f32 %v1346_v18, %v1334_v21 }
 0x4a3   : > { %v1352_v42 = vadd.f32 %v1348_v52, %v1324_v36  ;;  %v1354_v56 = vadd.f32 %v1350_v48, %v1326_v59  ;;  %v1355_v30 = vadd.f32 %v1351_v27, %v1327_v17  ;;  %v1353_v4 = vadd.f32 %v1349_v40, %v1325_v62 }
 0x4a5   : > { %v1413_v55 = vadd.f32 %v1399_v41, %v1352_v42  ;;  %v1415_v34 = vadd.f32 %v1407_v61, %v1354_v56  ;;  %v1416_v10 = vadd.f32 %v1411_v7, %v1355_v30  ;;  %v1414_v31 = vadd.f32 %v1403_v28, %v1353_v4 }
 0x4a7   : > { %vm1417_vm3 = vcmp.gt.f32.partialorder %v1413_v55, 0.0  ;;  %vm1419_vm4 = vcmp.gt.f32.partialorder %v1415_v34, 0.0  ;;  %vm1420_vm5 = vcmp.gt.f32.partialorder %v1416_v10, 0.0  ;;  %v1421_v54 = vmul.f32 0.01, %v1413_v55 }
 0x4a8   : > { %v1423_v23 = vmul.f32 0.01, %v1415_v34  ;;  %v1424_v14 = vmul.f32 0.01, %v1416_v10  ;;  %vm1418_vm6 = vcmp.gt.f32.partialorder %v1414_v31, 0.0 }
 0x4a9   : > { %v1425_v53 = vsel %vm1417_vm3, %v1413_v55, %v1421_v54  ;;  %v1422_v1 = vmul.f32 0.01, %v1414_v31 }
 0x4aa   : > { %v1427_v12 = vsel %vm1419_vm4, %v1415_v34, %v1423_v23  ;;  %v1428_v32 = vsel %vm1420_vm5, %v1416_v10, %v1424_v14  ;;  %1430 = vst.msk [vmem:[%s267_s5] sm:$0xf] %vm1429_vm2, %v1425_v53 }
 0x4ab   : > { %1432 = vst.msk [vmem:[%s267_s5 + $0x8] sm:$0xf] %vm1429_vm2, %v1427_v12  ;;  %1433 = vst.msk [vmem:[%s267_s5 + $0xc] sm:$0xf] %vm1429_vm2, %v1428_v32  ;;  %v1426_v3 = vsel %vm1418_vm6, %v1414_v31, %v1422_v1 }
 0x4ac   : > { %1431 = vst.msk [vmem:[%s267_s5 + $0x4] sm:$0xf] %vm1429_vm2, %v1426_v3 }
 0x4ad   : > { %1969 = shalt.err (!%p1966_p2)
}
 0x4ae   : > { %s1970_s8 = scalar_lea.hbm %s3327_s22, 256  ;;  %s1974_s25 = scalar_lea.hbm %s3385_s4, 512 }
 0x4af   : > { %p1971_p9 = scmp.ne.s32.totalorder %s3327_s22, %s1970_s8  ;;  %p1975_p6 = scmp.lt.u32.totalorder %s3327_s22, %s3385_s4 }
 0x4b0   : > { %p1976_p13 = scmp.lt.u32.totalorder %s1974_s25, %s1970_s8  ;;  %p1978_p0 = scmp.lt.u32.totalorder %s1970_s8, %s3327_s22 }
 0x4b1   : > { %p1972_p11 = pnand %p1971_p9, %p3594_p5 }
 0x4b2   : > { %p1977_p8 = por %p1976_p13, %p1975_p6 }
 0x4b3   : > { %p1973_p3 = pneg %p1972_p11 }
 0x4b4   : > { %p1979_p7 = por %p1978_p0, %p1977_p8 }
 0x4b6   : > { %p1980_p4 = pnand %p1979_p7, %p1973_p3 }
 0x4b8   : > { %1983 = shalt.err (!%p1980_p4)
}
 0x4b9   : > { %s2054_s9 = smov 4  }
 0x4ba   : > { %1681 = dma.vmem_to_hbm [thread:$0]  (%p3594_p5), %s3321_s6, 256, %s3327_s22, %s1435_s18, %s2052_s24, %s2052_s24, %s2054_s9  }
 0x4bb PF: > { %s1463_s14 = sand.u32 1, %s2022_s15   ;;  %p3595_p10 = scmp.ne.s32.totalorder %s3447_s30, 0 }
 0x4bc   : > { %p3596_p12 = scmp.ge.s32.totalorder %s2042_s20, 2  ;;  %s1464_s7 = scalar_lea.sflag [#allocation5], %s1463_s14 }
 0x4be   : > { %p1691_p1 = pnand %p3596_p12, %p3595_p10 }
 0x4c0   : > { %2017 = dma.done.wait (!%p1691_p1), %s1464_s7, 256  }
 0x4c1   : > { %2019 = vsyncadd (!%p1691_p1), %s1464_s7, 4294967040  ;;  %s23_s20 = sadd.s32 1, %s2042_s20   ;;  %s3597_s15 = smov %s2026_s16 }
 0x4c2   : > { %p20_p2 = scmp.ge.s32.totalorder %s23_s20, 4   ;;  %s3598_s16 = smov %s2030_s17 }
 0x4c3   : > { %s3599_s17 = smov %s2136_s29  ;;  %s3600_s18 = smov %s2038_s19 }
 0x4c4   : > { %s3601_s19 = smov %s3603_s23  ;;  %22 = sbr.rel (!%p20_p2) target bundleno = 8 (0x8), region = 102 }
 0x4cb   :  { %1469 = vsyncpa [#allocation4], 1 }
 0x4cc   :  { %1471 = vsyncpa [#allocation4 + $0x1], 1 }
 0x4cd   :  { %1472 = vsyncpa [#allocation7], 1 }
 0x4ce   :  { %1474 = vsyncpa [#allocation7 + $0x1], 1 }
 0x4cf   :  { %1475 = vsyncpa [#allocation5], 1 }
 0x4d0   :  { %1477 = vsyncpa [#allocation5 + $0x1], 1 }

</bundles_post_ra>
